<compile_context>
chip_gen: v7x
topology: tpu7x:2x2x1
jax: 0.10.0
libtpu: 0.0.40
codegen_flags: <defaults>
</compile_context>

<pallas_src>
import math
import jax
import jax.numpy as jnp
from jax import lax
from jax.experimental import pallas as pl
from jax.experimental.pallas import tpu as pltpu

# ---- ModelArgs (defaults from the PyTorch dataclass) ----
DIM = 64
N_HEADS = 8
HEAD_DIM = DIM // N_HEADS          # 8
MULTIPLE_OF = 64
EPS = 1e-5
ROPE_THETA = 100.0

# FeedForward hidden dim: 4*dim -> 2/3 -> round up to multiple_of
_hd = int(2 * (4 * DIM) / 3)
FFN_HIDDEN = MULTIPLE_OF * ((_hd + MULTIPLE_OF - 1) // MULTIPLE_OF)   # 192

NEG_INF = -1e30   # additive causal mask value (NaN-safe with row-max subtraction)


def transformer_block_kernel(
    x_ref,        # (Bt, S, D)        f32
    cos2_ref,     # (S, 2*D)          f32   [cos_full | cos_full]  (128 lanes)
    sin2_ref,     # (S, 2*D)          f32   [sin_full | sin_full]
    anw_ref,      # (1, D)            f32   attention_norm weight
    fnw_ref,      # (1, D)            f32   ffn_norm weight
    wproj_ref,    # (D, 5*D)          bf16  [Wq*s | Wk | (Wq*s)@R | Wk@R | Wv]
    wo_ref,       # (D, D)            bf16
    w13_ref,      # (D, 2*FFN_HIDDEN) bf16  [W1 | W3]
    w2_ref,       # (FFN_HIDDEN, D)   bf16
    o_ref,        # (Bt, S, D)        f32
    attn_ref,     # (Bt, S, D)        f32   VMEM scratch (per-head attention outputs)
):
    Bt, S, D = x_ref.shape
    rows = Bt * S

    x3 = x_ref[...]                                               # (Bt, S, D) f32
    x = x3.reshape(rows, D)                                       # free regrouping of sublanes

    # ---- attention_norm (RMSNorm, f32) ----
    ms = jnp.mean(x * x, axis=-1, keepdims=True)
    xn = x * lax.rsqrt(ms + EPS) * anw_ref[...]                   # (rows, D)

    # ---- fused Q/K/QR/KR/V projection (one wide bf16 MXU matmul) ----
    proj = jnp.dot(xn.astype(jnp.bfloat16), wproj_ref[...],
                   preferred_element_type=jnp.float32)            # (rows, 5D) f32
    proj3 = proj.reshape(Bt, S, 5 * D)

    # ---- RoPE: one full-width FMA on the aligned 128-lane [q|k] tile ----
    # cos/sin broadcast over the leading Bt axis (no jnp.tile, no per-batch copies).
    qk = (proj3[:, :, :2 * D] * cos2_ref[...][None]
          + proj3[:, :, 2 * D:4 * D] * sin2_ref[...][None])       # (Bt, S, 2D) f32
    qk = qk.astype(jnp.bfloat16)                                  # q already holds 1/sqrt(Dh)
    v3 = proj3[:, :, 4 * D:].astype(jnp.bfloat16)                 # (Bt, S, D)

    # ---- causal additive mask generated in-kernel, hoisted out of the head loop ----
    row = lax.broadcasted_iota(jnp.int32, (S, S), 0)
    col = lax.broadcasted_iota(jnp.int32, (S, S), 1)
    mask = jnp.where(col <= row, 0.0, NEG_INF).astype(jnp.float32)
    maskb = jnp.broadcast_to(mask[None], (Bt, S, S))              # broadcast once, reused 8x

    # ---- attention: loop over heads only (8 iters); each head is batched over Bt and its
    #      output goes straight to VMEM scratch at lane offset h*HEAD_DIM (no concat chains).
    for h in range(N_HEADS):
        qs = slice(h * HEAD_DIM, (h + 1) * HEAD_DIM)
        ks = slice(D + h * HEAD_DIM, D + (h + 1) * HEAD_DIM)
        qh = qk[:, :, qs]                                         # (Bt, S, Dh) bf16
        kh = qk[:, :, ks]                                         # (Bt, S, Dh) bf16
        vh = v3[:, :, qs]                                         # (Bt, S, Dh) bf16
        s = jnp.einsum('bqd,bkd->bqk', qh, kh,
                       preferred_element_type=jnp.float32) + maskb
        s = s - jnp.max(s, axis=-1, keepdims=True)
        p = jnp.exp(s)
        p = p * pl.reciprocal(jnp.sum(p, axis=-1, keepdims=True), approx=True)
        attn_ref[:, :, qs] = jnp.einsum('bqk,bkd->bqd', p.astype(jnp.bfloat16), vh,
                                        preferred_element_type=jnp.float32)

    attn = attn_ref[...].reshape(rows, D)                         # (rows, D) f32

    # ---- output projection + residual ----
    h1 = x + jnp.dot(attn.astype(jnp.bfloat16), wo_ref[...],
                     preferred_element_type=jnp.float32)          # f32

    # ---- ffn_norm (RMSNorm, f32) ----
    ms2 = jnp.mean(h1 * h1, axis=-1, keepdims=True)
    hn = h1 * lax.rsqrt(ms2 + EPS) * fnw_ref[...]

    # ---- SwiGLU FFN: one fused [W1|W3] matmul, silu gate, W2, residual ----
    gu = jnp.dot(hn.astype(jnp.bfloat16), w13_ref[...],
                 preferred_element_type=jnp.float32)              # (rows, 2F)
    g = gu[:, :FFN_HIDDEN]
    u = gu[:, FFN_HIDDEN:]
    act = g * jax.nn.sigmoid(g) * u                               # f32
    ff = jnp.dot(act.astype(jnp.bfloat16), w2_ref[...],
                 preferred_element_type=jnp.float32)

    o_ref[...] = (h1 + ff).reshape(Bt, S, D)


def _num_tensorcores():
    """Best-effort TensorCores-per-device count (2 on v7x; 1 on v5e/v6e). Safe fallback = 1."""
    n = 1
    try:
        d = jax.devices()[0]
        for attr in ("num_cores", "core_count"):
            v = getattr(d, attr, None)
            if v:
                n = max(n, int(v))
    except Exception:
        pass
    try:
        info = pltpu.get_tpu_info()
        for attr in ("num_cores", "num_tensorcores", "tensorcores_per_chip"):
            v = getattr(info, attr, None)
            if v:
                n = max(n, int(v))
    except Exception:
        pass
    return n


def _choose_bt(B, S, rows_target=1024):
    """Batch-elements per grid step: target ~rows_target rows/step to amortize per-step
    overhead; only force multiple grid steps when the chip actually has >1 TensorCore."""
    bt = max(1, min(B, rows_target // max(S, 1)))
    ncores = _num_tensorcores()
    if ncores >= 2:
        while bt > 1 and pl.cdiv(B, bt) < ncores:
            bt = max(1, bt // 2)
    while B % bt != 0:          # keep the grid exact (no partial blocks)
        bt -= 1
    return bt


def transformer_block(x, params, cos_full, sin_full, rot_mat, rows_target=1024):
    B, S, D = x.shape
    Bt = _choose_bt(B, S, rows_target)
    grid = (B // Bt,)

    # ---- wrapper-side weight fusion (plain JAX, done once per call) ----
    scale = 1.0 / math.sqrt(HEAD_DIM)
    wq_s = params["wq_t"] * scale
    # column order [Wq*s | Wk | (Wq*s)@R | Wk@R | Wv]: RoPE applies to the lane-tile-aligned
    # first 128 lanes of the projection output in a single full-width FMA.
    wproj = jnp.concatenate(
        [wq_s, params["wk_t"], wq_s @ rot_mat, params["wk_t"] @ rot_mat, params["wv_t"]],
        axis=1).astype(jnp.bfloat16)                               # (D, 5D)
    w13 = jnp.concatenate([params["w1_t"], params["w3_t"]], axis=1).astype(jnp.bfloat16)
    wo = params["wo_t"].astype(jnp.bfloat16)
    w2 = params["w2_t"].astype(jnp.bfloat16)

    # 128-lane cos/sin tables covering [q | k] in one shot
    cos2 = jnp.concatenate([cos_full, cos_full], axis=-1)          # (S, 2D)
    sin2 = jnp.concatenate([sin_full, sin_full], axis=-1)

    full2d = lambda shp: pl.BlockSpec(shp, lambda b: (0, 0))
    return pl.pallas_call(
        transformer_block_kernel,
        out_shape=jax.ShapeDtypeStruct((B, S, D), jnp.float32),
        grid=grid,
        in_specs=[
            pl.BlockSpec((Bt, S, D), lambda b: (b, 0, 0)),         # x
            full2d((S, 2 * D)),                                    # cos2
            full2d((S, 2 * D)),                                    # sin2
            full2d((1, D)),                                        # attn_norm weight
            full2d((1, D)),                                        # ffn_norm weight
            full2d((D, 5 * D)),                                    # fused projection
            full2d((D, D)),                                        # wo
            full2d((D, 2 * FFN_HIDDEN)),                           # [w1|w3]
            full2d((FFN_HIDDEN, D)),                               # w2
        ],
        out_specs=pl.BlockSpec((Bt, S, D), lambda b: (b, 0, 0)),
        scratch_shapes=[pltpu.VMEM((Bt, S, D), jnp.float32)],      # per-head attention outputs
        compiler_params=pltpu.CompilerParams(
            dimension_semantics=("parallel",),
            vmem_limit_bytes=48 * 1024 * 1024,                     # above v5e's 16 MiB default
        ),
    )(x, cos2, sin2,
      params["attn_norm"][None, :], params["ffn_norm"][None, :],
      wproj, wo, w13, w2)


# ---------------- helpers (plain JAX "glue") ----------------

def make_rope_tables(seq_len, start_pos=0):
    """cos/sin tables: half-dim (S, Dh/2) and full interleaved/tiled (S, D), plus rotation matrix."""
    idx = jnp.arange(0, HEAD_DIM, 2, dtype=jnp.float32)
    freqs = 1.0 / (ROPE_THETA ** (idx / HEAD_DIM))                 # (Dh/2,)
    t = jnp.arange(start_pos, start_pos + seq_len, dtype=jnp.float32)
    angles = jnp.outer(t, freqs)                                   # (S, Dh/2)
    cos_half, sin_half = jnp.cos(angles), jnp.sin(angles)
    # interleave-repeat within a head, then tile over heads -> (S, D)
    cos_full = jnp.tile(jnp.repeat(cos_half, 2, axis=-1), (1, N_HEADS))
    sin_full = jnp.tile(jnp.repeat(sin_half, 2, axis=-1), (1, N_HEADS))
    # pair rotation matrix: (a, b) -> (-b, a)
    R = jnp.zeros((DIM, DIM), dtype=jnp.float32)
    i = jnp.arange(0, DIM, 2)
    R = R.at[i, i + 1].set(1.0)
    R = R.at[i + 1, i].set(-1.0)
    return cos_half, sin_half, cos_full, sin_full, R


def init_params(key):
    ks = jax.random.split(key, 7)
    def lin(k, fan_in, fan_out):
        # nn.Linear-style uniform init, stored pre-transposed (in, out)
        bound = 1.0 / math.sqrt(fan_in)
        return jax.random.uniform(k, (fan_in, fan_out), jnp.float32, -bound, bound)
    return {
        "wq_t": lin(ks[0], DIM, DIM),
        "wk_t": lin(ks[1], DIM, DIM),
        "wv_t": lin(ks[2], DIM, DIM),
        "wo_t": lin(ks[3], DIM, DIM),
        "w1_t": lin(ks[4], DIM, FFN_HIDDEN),
        "w3_t": lin(ks[5], DIM, FFN_HIDDEN),
        "w2_t": lin(ks[6], FFN_HIDDEN, DIM),
        "attn_norm": jnp.ones((DIM,), jnp.float32),
        "ffn_norm": jnp.ones((DIM,), jnp.float32),
    }


def transformer_block_ref(x, params, cos_half, sin_half, mask):
    """Plain-JAX f32 reference mirroring the PyTorch forward (complex-pair RoPE via reshape)."""
    B, S, D = x.shape

    def rms(v, w):
        return v * lax.rsqrt(jnp.mean(v * v, -1, keepdims=True) + EPS) * w

    xn = rms(x, params["attn_norm"])
    q = (xn @ params["wq_t"]).reshape(B, S, N_HEADS, HEAD_DIM)
    k = (xn @ params["wk_t"]).reshape(B, S, N_HEADS, HEAD_DIM)
    v = (xn @ params["wv_t"]).reshape(B, S, N_HEADS, HEAD_DIM)

    def rope(t):
        tp = t.reshape(B, S, N_HEADS, HEAD_DIM // 2, 2)
        tr, ti = tp[..., 0], tp[..., 1]
        c = cos_half[None, :, None, :]
        s = sin_half[None, :, None, :]
        return jnp.stack([tr * c - ti * s, tr * s + ti * c], axis=-1).reshape(t.shape)

    q, k = rope(q), rope(k)
    q = q.transpose(0, 2, 1, 3)
    k = k.transpose(0, 2, 1, 3)
    v = v.transpose(0, 2, 1, 3)
    scores = jnp.einsum("bhqd,bhkd->bhqk", q, k) / math.sqrt(HEAD_DIM) + mask
    p = jax.nn.softmax(scores, axis=-1)
    o = jnp.einsum("bhqk,bhkd->bhqd", p, v).transpose(0, 2, 1, 3).reshape(B, S, D)
    h1 = x + o @ params["wo_t"]
    hn = rms(h1, params["ffn_norm"])
    return h1 + (jax.nn.silu(hn @ params["w1_t"]) * (hn @ params["w3_t"])) @ params["w2_t"]


if __name__ == "__main__":
    B, S = 2, 8
    key = jax.random.PRNGKey(0)
    kx, kp = jax.random.split(key)
    x = jax.random.normal(kx, (B, S, DIM), jnp.float32)
    params = init_params(kp)

    cos_half, sin_half, cos_full, sin_full, rot_mat = make_rope_tables(S, start_pos=0)

    out = transformer_block(x, params, cos_full, sin_full, rot_mat)
    out = jax.block_until_ready(out)

    # causal additive mask for the f32 reference (kernel builds it in-kernel)
    row = jnp.arange(S)[:, None]
    col = jnp.arange(S)[None, :]
    mask = jnp.where(col <= row, 0.0, NEG_INF).astype(jnp.float32)
    ref = transformer_block_ref(x, params, cos_half, sin_half, mask)

    # tolerance loosened slightly vs pure-f32 because matmuls run in bf16 (f32 accumulation)
    assert jnp.allclose(out, ref, rtol=2e-2, atol=2e-2), (
        f"mismatch vs reference: max abs err {float(jnp.max(jnp.abs(out - ref)))}")

    print("KERNEL_OK")
</pallas_src>

<mosaic_0001>
module attributes {stable_mosaic.version = 11 : i64} {
  func.func @transformer_block_kernel(%arg0: i32, %arg1: memref<2x8x64xf32, #tpu.memory_space<vmem>>, %arg2: memref<8x128xf32, #tpu.memory_space<vmem>>, %arg3: memref<8x128xf32, #tpu.memory_space<vmem>>, %arg4: memref<1x64xf32, #tpu.memory_space<vmem>>, %arg5: memref<1x64xf32, #tpu.memory_space<vmem>>, %arg6: memref<64x320xbf16, #tpu.memory_space<vmem>>, %arg7: memref<64x64xbf16, #tpu.memory_space<vmem>>, %arg8: memref<64x384xbf16, #tpu.memory_space<vmem>>, %arg9: memref<192x64xbf16, #tpu.memory_space<vmem>>, %arg10: memref<2x8x64xf32, #tpu.memory_space<vmem>>, %arg11: memref<2x8x64xf32, #tpu.memory_space<vmem>>) attributes {dimension_semantics = [#tpu.dimension_semantics<parallel>], iteration_bounds = array<i64: 1>, scalar_prefetch = 0 : i64, scratch_operands = 1 : i64, tpu.core_type = #tpu.core_type<tc>, window_params = [{transform_indices = @transform_0, window_bounds = array<i64: 2, 8, 64>}, {pipeline_mode = #tpu.pipeline_mode<synchronous>, transform_indices = @transform_1, window_bounds = array<i64: 8, 128>}, {pipeline_mode = #tpu.pipeline_mode<synchronous>, transform_indices = @transform_2, window_bounds = array<i64: 8, 128>}, {pipeline_mode = #tpu.pipeline_mode<synchronous>, transform_indices = @transform_3, window_bounds = array<i64: 1, 64>}, {pipeline_mode = #tpu.pipeline_mode<synchronous>, transform_indices = @transform_4, window_bounds = array<i64: 1, 64>}, {pipeline_mode = #tpu.pipeline_mode<synchronous>, transform_indices = @transform_5, window_bounds = array<i64: 64, 320>}, {pipeline_mode = #tpu.pipeline_mode<synchronous>, transform_indices = @transform_6, window_bounds = array<i64: 64, 64>}, {pipeline_mode = #tpu.pipeline_mode<synchronous>, transform_indices = @transform_7, window_bounds = array<i64: 64, 384>}, {pipeline_mode = #tpu.pipeline_mode<synchronous>, transform_indices = @transform_8, window_bounds = array<i64: 192, 64>}, {transform_indices = @transform_9, window_bounds = array<i64: 2, 8, 64>}]} {
    %c0 = arith.constant 0 : index
    %c0_0 = arith.constant 0 : index
    %c0_1 = arith.constant 0 : index
    %0 = vector.load %arg1[%c0, %c0_0, %c0_1] : memref<2x8x64xf32, #tpu.memory_space<vmem>>, vector<2x8x64xf32>
    %1 = vector.shape_cast %0 : vector<2x8x64xf32> to vector<16x64xf32>
    %2 = arith.mulf %1, %1 : vector<16x64xf32>
    %cst = arith.constant dense<0.000000e+00> : vector<16xf32>
    %3 = vector.multi_reduction <add>, %2, %cst [1] : vector<16x64xf32> to vector<16xf32>
    %4 = vector.shape_cast %3 : vector<16xf32> to vector<16x1xf32>
    %cst_2 = arith.constant 6.400000e+01 : f32
    %5 = vector.broadcast %cst_2 : f32 to vector<16x1xf32>
    %6 = arith.divf %4, %5 : vector<16x1xf32>
    %cst_3 = arith.constant 9.99999974E-6 : f32
    %7 = vector.broadcast %cst_3 : f32 to vector<16x1xf32>
    %8 = arith.addf %6, %7 : vector<16x1xf32>
    %9 = math.rsqrt %8 : vector<16x1xf32>
    %10 = vector.broadcast %9 : vector<16x1xf32> to vector<16x64xf32>
    %11 = arith.mulf %1, %10 : vector<16x64xf32>
    %c0_4 = arith.constant 0 : index
    %c0_5 = arith.constant 0 : index
    %12 = vector.load %arg4[%c0_4, %c0_5] : memref<1x64xf32, #tpu.memory_space<vmem>>, vector<1x64xf32>
    %13 = vector.broadcast %12 : vector<1x64xf32> to vector<16x64xf32>
    %14 = arith.mulf %11, %13 : vector<16x64xf32>
    %15 = arith.truncf %14 : vector<16x64xf32> to vector<16x64xbf16>
    %c0_6 = arith.constant 0 : index
    %c0_7 = arith.constant 0 : index
    %16 = vector.load %arg6[%c0_6, %c0_7] : memref<64x320xbf16, #tpu.memory_space<vmem>>, vector<64x320xbf16>
    %cst_8 = arith.constant dense<0.000000e+00> : vector<16x320xf32>
    %17 = tpu.matmul %15, %16, %cst_8 {dimension_numbers = #tpu.dot_dimension_numbers<[1], [0], [0], [1], [0, 0, 1, 1], [], []>} : vector<16x64xbf16>, vector<64x320xbf16>, vector<16x320xf32> -> vector<16x320xf32>
    %18 = vector.shape_cast %17 : vector<16x320xf32> to vector<2x8x320xf32>
    %19 = vector.extract_strided_slice %18 {offsets = [0, 0, 0], sizes = [2, 8, 128], strides = [1, 1, 1]} : vector<2x8x320xf32> to vector<2x8x128xf32>
    %c0_9 = arith.constant 0 : index
    %c0_10 = arith.constant 0 : index
    %20 = vector.load %arg2[%c0_9, %c0_10] : memref<8x128xf32, #tpu.memory_space<vmem>>, vector<8x128xf32>
    %21 = vector.shape_cast %20 : vector<8x128xf32> to vector<1x8x128xf32>
    %22 = vector.broadcast %21 : vector<1x8x128xf32> to vector<2x8x128xf32>
    %23 = arith.mulf %19, %22 : vector<2x8x128xf32>
    %24 = vector.extract_strided_slice %18 {offsets = [0, 0, 128], sizes = [2, 8, 128], strides = [1, 1, 1]} : vector<2x8x320xf32> to vector<2x8x128xf32>
    %c0_11 = arith.constant 0 : index
    %c0_12 = arith.constant 0 : index
    %25 = vector.load %arg3[%c0_11, %c0_12] : memref<8x128xf32, #tpu.memory_space<vmem>>, vector<8x128xf32>
    %26 = vector.shape_cast %25 : vector<8x128xf32> to vector<1x8x128xf32>
    %27 = vector.broadcast %26 : vector<1x8x128xf32> to vector<2x8x128xf32>
    %28 = arith.mulf %24, %27 : vector<2x8x128xf32>
    %29 = arith.addf %23, %28 : vector<2x8x128xf32>
    %30 = arith.truncf %29 : vector<2x8x128xf32> to vector<2x8x128xbf16>
    %31 = vector.extract_strided_slice %18 {offsets = [0, 0, 256], sizes = [2, 8, 64], strides = [1, 1, 1]} : vector<2x8x320xf32> to vector<2x8x64xf32>
    %32 = arith.truncf %31 : vector<2x8x64xf32> to vector<2x8x64xbf16>
    %33 = tpu.iota {dimensions = array<i32: 0>} : vector<8x8xi32>
    %34 = tpu.iota {dimensions = array<i32: 1>} : vector<8x8xi32>
    %35 = arith.cmpi sle, %34, %33 : vector<8x8xi32>
    %cst_13 = arith.constant 0.000000e+00 : f32
    %cst_14 = arith.constant -1.000000e+30 : f32
    %36 = vector.broadcast %cst_13 : f32 to vector<8x8xf32>
    %37 = vector.broadcast %cst_14 : f32 to vector<8x8xf32>
    %38 = arith.select %35, %36, %37 : vector<8x8xi1>, vector<8x8xf32>
    %39 = vector.shape_cast %38 : vector<8x8xf32> to vector<1x8x8xf32>
    %40 = vector.shape_cast %39 : vector<1x8x8xf32> to vector<1x8x8xf32>
    %41 = vector.broadcast %40 : vector<1x8x8xf32> to vector<2x8x8xf32>
    %42 = vector.extract_strided_slice %30 {offsets = [0, 0, 0], sizes = [2, 8, 8], strides = [1, 1, 1]} : vector<2x8x128xbf16> to vector<2x8x8xbf16>
    %43 = vector.extract_strided_slice %30 {offsets = [0, 0, 64], sizes = [2, 8, 8], strides = [1, 1, 1]} : vector<2x8x128xbf16> to vector<2x8x8xbf16>
    %44 = vector.extract_strided_slice %32 {offsets = [0, 0, 0], sizes = [2, 8, 8], strides = [1, 1, 1]} : vector<2x8x64xbf16> to vector<2x8x8xbf16>
    "tpu.trace_start"() <{level = 10 : i32, message = "bqd,bkd->bqk"}> : () -> ()
    %cst_15 = arith.constant dense<0.000000e+00> : vector<2x8x8xf32>
    %45 = tpu.matmul %42, %43, %cst_15 {dimension_numbers = #tpu.dot_dimension_numbers<[2], [2], [1], [1], [0, 0, 0, 1, 1, 1], [0], [0]>} : vector<2x8x8xbf16>, vector<2x8x8xbf16>, vector<2x8x8xf32> -> vector<2x8x8xf32>
    "tpu.trace_stop"() : () -> ()
    %46 = arith.addf %45, %41 : vector<2x8x8xf32>
    %cst_16 = arith.constant dense<0xFF800000> : vector<2x8xf32>
    %47 = vector.multi_reduction <maximumf>, %46, %cst_16 [2] : vector<2x8x8xf32> to vector<2x8xf32>
    %48 = vector.shape_cast %47 : vector<2x8xf32> to vector<2x8x1xf32>
    %49 = vector.broadcast %48 : vector<2x8x1xf32> to vector<2x8x8xf32>
    %50 = arith.subf %46, %49 : vector<2x8x8xf32>
    %51 = math.exp %50 : vector<2x8x8xf32>
    %cst_17 = arith.constant dense<0.000000e+00> : vector<2x8xf32>
    %52 = vector.multi_reduction <add>, %51, %cst_17 [2] : vector<2x8x8xf32> to vector<2x8xf32>
    %53 = vector.shape_cast %52 : vector<2x8xf32> to vector<2x8x1xf32>
    %54 = tpu.reciprocal %53 {approx = true} : vector<2x8x1xf32> -> vector<2x8x1xf32>
    %55 = vector.broadcast %54 : vector<2x8x1xf32> to vector<2x8x8xf32>
    %56 = arith.mulf %51, %55 : vector<2x8x8xf32>
    %57 = arith.truncf %56 : vector<2x8x8xf32> to vector<2x8x8xbf16>
    "tpu.trace_start"() <{level = 10 : i32, message = "bqk,bkd->bqd"}> : () -> ()
    %cst_18 = arith.constant dense<0.000000e+00> : vector<2x8x8xf32>
    %58 = tpu.matmul %57, %44, %cst_18 {dimension_numbers = #tpu.dot_dimension_numbers<[2], [1], [1], [2], [0, 0, 0, 1, 1, 2], [0], [0]>} : vector<2x8x8xbf16>, vector<2x8x8xbf16>, vector<2x8x8xf32> -> vector<2x8x8xf32>
    "tpu.trace_stop"() : () -> ()
    %c0_19 = arith.constant 0 : index
    %c0_20 = arith.constant 0 : index
    %c0_21 = arith.constant 0 : index
    %59 = vector.load %arg11[%c0_19, %c0_20, %c0_21] : memref<2x8x64xf32, #tpu.memory_space<vmem>>, vector<2x8x8xf32>
    tpu.vector_store %arg11[%c0_19, %c0_20, %c0_21], %58 {strides = array<i32>} : memref<2x8x64xf32, #tpu.memory_space<vmem>>, vector<2x8x8xf32>,
    %60 = vector.extract_strided_slice %30 {offsets = [0, 0, 8], sizes = [2, 8, 8], strides = [1, 1, 1]} : vector<2x8x128xbf16> to vector<2x8x8xbf16>
    %61 = vector.extract_strided_slice %30 {offsets = [0, 0, 72], sizes = [2, 8, 8], strides = [1, 1, 1]} : vector<2x8x128xbf16> to vector<2x8x8xbf16>
    %62 = vector.extract_strided_slice %32 {offsets = [0, 0, 8], sizes = [2, 8, 8], strides = [1, 1, 1]} : vector<2x8x64xbf16> to vector<2x8x8xbf16>
    "tpu.trace_start"() <{level = 10 : i32, message = "bqd,bkd->bqk"}> : () -> ()
    %cst_22 = arith.constant dense<0.000000e+00> : vector<2x8x8xf32>
    %63 = tpu.matmul %60, %61, %cst_22 {dimension_numbers = #tpu.dot_dimension_numbers<[2], [2], [1], [1], [0, 0, 0, 1, 1, 1], [0], [0]>} : vector<2x8x8xbf16>, vector<2x8x8xbf16>, vector<2x8x8xf32> -> vector<2x8x8xf32>
    "tpu.trace_stop"() : () -> ()
    %64 = arith.addf %63, %41 : vector<2x8x8xf32>
    %cst_23 = arith.constant dense<0xFF800000> : vector<2x8xf32>
    %65 = vector.multi_reduction <maximumf>, %64, %cst_23 [2] : vector<2x8x8xf32> to vector<2x8xf32>
    %66 = vector.shape_cast %65 : vector<2x8xf32> to vector<2x8x1xf32>
    %67 = vector.broadcast %66 : vector<2x8x1xf32> to vector<2x8x8xf32>
    %68 = arith.subf %64, %67 : vector<2x8x8xf32>
    %69 = math.exp %68 : vector<2x8x8xf32>
    %cst_24 = arith.constant dense<0.000000e+00> : vector<2x8xf32>
    %70 = vector.multi_reduction <add>, %69, %cst_24 [2] : vector<2x8x8xf32> to vector<2x8xf32>
    %71 = vector.shape_cast %70 : vector<2x8xf32> to vector<2x8x1xf32>
    %72 = tpu.reciprocal %71 {approx = true} : vector<2x8x1xf32> -> vector<2x8x1xf32>
    %73 = vector.broadcast %72 : vector<2x8x1xf32> to vector<2x8x8xf32>
    %74 = arith.mulf %69, %73 : vector<2x8x8xf32>
    %75 = arith.truncf %74 : vector<2x8x8xf32> to vector<2x8x8xbf16>
    "tpu.trace_start"() <{level = 10 : i32, message = "bqk,bkd->bqd"}> : () -> ()
    %cst_25 = arith.constant dense<0.000000e+00> : vector<2x8x8xf32>
    %76 = tpu.matmul %75, %62, %cst_25 {dimension_numbers = #tpu.dot_dimension_numbers<[2], [1], [1], [2], [0, 0, 0, 1, 1, 2], [0], [0]>} : vector<2x8x8xbf16>, vector<2x8x8xbf16>, vector<2x8x8xf32> -> vector<2x8x8xf32>
    "tpu.trace_stop"() : () -> ()
    %c0_26 = arith.constant 0 : index
    %c0_27 = arith.constant 0 : index
    %c8 = arith.constant 8 : index
    %77 = vector.load %arg11[%c0_26, %c0_27, %c8] : memref<2x8x64xf32, #tpu.memory_space<vmem>>, vector<2x8x8xf32>
    tpu.vector_store %arg11[%c0_26, %c0_27, %c8], %76 {strides = array<i32>} : memref<2x8x64xf32, #tpu.memory_space<vmem>>, vector<2x8x8xf32>,
    %78 = vector.extract_strided_slice %30 {offsets = [0, 0, 16], sizes = [2, 8, 8], strides = [1, 1, 1]} : vector<2x8x128xbf16> to vector<2x8x8xbf16>
    %79 = vector.extract_strided_slice %30 {offsets = [0, 0, 80], sizes = [2, 8, 8], strides = [1, 1, 1]} : vector<2x8x128xbf16> to vector<2x8x8xbf16>
    %80 = vector.extract_strided_slice %32 {offsets = [0, 0, 16], sizes = [2, 8, 8], strides = [1, 1, 1]} : vector<2x8x64xbf16> to vector<2x8x8xbf16>
    "tpu.trace_start"() <{level = 10 : i32, message = "bqd,bkd->bqk"}> : () -> ()
    %cst_28 = arith.constant dense<0.000000e+00> : vector<2x8x8xf32>
    %81 = tpu.matmul %78, %79, %cst_28 {dimension_numbers = #tpu.dot_dimension_numbers<[2], [2], [1], [1], [0, 0, 0, 1, 1, 1], [0], [0]>} : vector<2x8x8xbf16>, vector<2x8x8xbf16>, vector<2x8x8xf32> -> vector<2x8x8xf32>
    "tpu.trace_stop"() : () -> ()
    %82 = arith.addf %81, %41 : vector<2x8x8xf32>
    %cst_29 = arith.constant dense<0xFF800000> : vector<2x8xf32>
    %83 = vector.multi_reduction <maximumf>, %82, %cst_29 [2] : vector<2x8x8xf32> to vector<2x8xf32>
    %84 = vector.shape_cast %83 : vector<2x8xf32> to vector<2x8x1xf32>
    %85 = vector.broadcast %84 : vector<2x8x1xf32> to vector<2x8x8xf32>
    %86 = arith.subf %82, %85 : vector<2x8x8xf32>
    %87 = math.exp %86 : vector<2x8x8xf32>
    %cst_30 = arith.constant dense<0.000000e+00> : vector<2x8xf32>
    %88 = vector.multi_reduction <add>, %87, %cst_30 [2] : vector<2x8x8xf32> to vector<2x8xf32>
    %89 = vector.shape_cast %88 : vector<2x8xf32> to vector<2x8x1xf32>
    %90 = tpu.reciprocal %89 {approx = true} : vector<2x8x1xf32> -> vector<2x8x1xf32>
    %91 = vector.broadcast %90 : vector<2x8x1xf32> to vector<2x8x8xf32>
    %92 = arith.mulf %87, %91 : vector<2x8x8xf32>
    %93 = arith.truncf %92 : vector<2x8x8xf32> to vector<2x8x8xbf16>
    "tpu.trace_start"() <{level = 10 : i32, message = "bqk,bkd->bqd"}> : () -> ()
    %cst_31 = arith.constant dense<0.000000e+00> : vector<2x8x8xf32>
    %94 = tpu.matmul %93, %80, %cst_31 {dimension_numbers = #tpu.dot_dimension_numbers<[2], [1], [1], [2], [0, 0, 0, 1, 1, 2], [0], [0]>} : vector<2x8x8xbf16>, vector<2x8x8xbf16>, vector<2x8x8xf32> -> vector<2x8x8xf32>
    "tpu.trace_stop"() : () -> ()
    %c0_32 = arith.constant 0 : index
    %c0_33 = arith.constant 0 : index
    %c16 = arith.constant 16 : index
    %95 = vector.load %arg11[%c0_32, %c0_33, %c16] : memref<2x8x64xf32, #tpu.memory_space<vmem>>, vector<2x8x8xf32>
    tpu.vector_store %arg11[%c0_32, %c0_33, %c16], %94 {strides = array<i32>} : memref<2x8x64xf32, #tpu.memory_space<vmem>>, vector<2x8x8xf32>,
    %96 = vector.extract_strided_slice %30 {offsets = [0, 0, 24], sizes = [2, 8, 8], strides = [1, 1, 1]} : vector<2x8x128xbf16> to vector<2x8x8xbf16>
    %97 = vector.extract_strided_slice %30 {offsets = [0, 0, 88], sizes = [2, 8, 8], strides = [1, 1, 1]} : vector<2x8x128xbf16> to vector<2x8x8xbf16>
    %98 = vector.extract_strided_slice %32 {offsets = [0, 0, 24], sizes = [2, 8, 8], strides = [1, 1, 1]} : vector<2x8x64xbf16> to vector<2x8x8xbf16>
    "tpu.trace_start"() <{level = 10 : i32, message = "bqd,bkd->bqk"}> : () -> ()
    %cst_34 = arith.constant dense<0.000000e+00> : vector<2x8x8xf32>
    %99 = tpu.matmul %96, %97, %cst_34 {dimension_numbers = #tpu.dot_dimension_numbers<[2], [2], [1], [1], [0, 0, 0, 1, 1, 1], [0], [0]>} : vector<2x8x8xbf16>, vector<2x8x8xbf16>, vector<2x8x8xf32> -> vector<2x8x8xf32>
    "tpu.trace_stop"() : () -> ()
    %100 = arith.addf %99, %41 : vector<2x8x8xf32>
    %cst_35 = arith.constant dense<0xFF800000> : vector<2x8xf32>
    %101 = vector.multi_reduction <maximumf>, %100, %cst_35 [2] : vector<2x8x8xf32> to vector<2x8xf32>
    %102 = vector.shape_cast %101 : vector<2x8xf32> to vector<2x8x1xf32>
    %103 = vector.broadcast %102 : vector<2x8x1xf32> to vector<2x8x8xf32>
    %104 = arith.subf %100, %103 : vector<2x8x8xf32>
    %105 = math.exp %104 : vector<2x8x8xf32>
    %cst_36 = arith.constant dense<0.000000e+00> : vector<2x8xf32>
    %106 = vector.multi_reduction <add>, %105, %cst_36 [2] : vector<2x8x8xf32> to vector<2x8xf32>
    %107 = vector.shape_cast %106 : vector<2x8xf32> to vector<2x8x1xf32>
    %108 = tpu.reciprocal %107 {approx = true} : vector<2x8x1xf32> -> vector<2x8x1xf32>
    %109 = vector.broadcast %108 : vector<2x8x1xf32> to vector<2x8x8xf32>
    %110 = arith.mulf %105, %109 : vector<2x8x8xf32>
    %111 = arith.truncf %110 : vector<2x8x8xf32> to vector<2x8x8xbf16>
    "tpu.trace_start"() <{level = 10 : i32, message = "bqk,bkd->bqd"}> : () -> ()
    %cst_37 = arith.constant dense<0.000000e+00> : vector<2x8x8xf32>
    %112 = tpu.matmul %111, %98, %cst_37 {dimension_numbers = #tpu.dot_dimension_numbers<[2], [1], [1], [2], [0, 0, 0, 1, 1, 2], [0], [0]>} : vector<2x8x8xbf16>, vector<2x8x8xbf16>, vector<2x8x8xf32> -> vector<2x8x8xf32>
    "tpu.trace_stop"() : () -> ()
    %c0_38 = arith.constant 0 : index
    %c0_39 = arith.constant 0 : index
    %c24 = arith.constant 24 : index
    %113 = vector.load %arg11[%c0_38, %c0_39, %c24] : memref<2x8x64xf32, #tpu.memory_space<vmem>>, vector<2x8x8xf32>
    tpu.vector_store %arg11[%c0_38, %c0_39, %c24], %112 {strides = array<i32>} : memref<2x8x64xf32, #tpu.memory_space<vmem>>, vector<2x8x8xf32>,
    %114 = vector.extract_strided_slice %30 {offsets = [0, 0, 32], sizes = [2, 8, 8], strides = [1, 1, 1]} : vector<2x8x128xbf16> to vector<2x8x8xbf16>
    %115 = vector.extract_strided_slice %30 {offsets = [0, 0, 96], sizes = [2, 8, 8], strides = [1, 1, 1]} : vector<2x8x128xbf16> to vector<2x8x8xbf16>
    %116 = vector.extract_strided_slice %32 {offsets = [0, 0, 32], sizes = [2, 8, 8], strides = [1, 1, 1]} : vector<2x8x64xbf16> to vector<2x8x8xbf16>
    "tpu.trace_start"() <{level = 10 : i32, message = "bqd,bkd->bqk"}> : () -> ()
    %cst_40 = arith.constant dense<0.000000e+00> : vector<2x8x8xf32>
    %117 = tpu.matmul %114, %115, %cst_40 {dimension_numbers = #tpu.dot_dimension_numbers<[2], [2], [1], [1], [0, 0, 0, 1, 1, 1], [0], [0]>} : vector<2x8x8xbf16>, vector<2x8x8xbf16>, vector<2x8x8xf32> -> vector<2x8x8xf32>
    "tpu.trace_stop"() : () -> ()
    %118 = arith.addf %117, %41 : vector<2x8x8xf32>
    %cst_41 = arith.constant dense<0xFF800000> : vector<2x8xf32>
    %119 = vector.multi_reduction <maximumf>, %118, %cst_41 [2] : vector<2x8x8xf32> to vector<2x8xf32>
    %120 = vector.shape_cast %119 : vector<2x8xf32> to vector<2x8x1xf32>
    %121 = vector.broadcast %120 : vector<2x8x1xf32> to vector<2x8x8xf32>
    %122 = arith.subf %118, %121 : vector<2x8x8xf32>
    %123 = math.exp %122 : vector<2x8x8xf32>
    %cst_42 = arith.constant dense<0.000000e+00> : vector<2x8xf32>
    %124 = vector.multi_reduction <add>, %123, %cst_42 [2] : vector<2x8x8xf32> to vector<2x8xf32>
    %125 = vector.shape_cast %124 : vector<2x8xf32> to vector<2x8x1xf32>
    %126 = tpu.reciprocal %125 {approx = true} : vector<2x8x1xf32> -> vector<2x8x1xf32>
    %127 = vector.broadcast %126 : vector<2x8x1xf32> to vector<2x8x8xf32>
    %128 = arith.mulf %123, %127 : vector<2x8x8xf32>
    %129 = arith.truncf %128 : vector<2x8x8xf32> to vector<2x8x8xbf16>
    "tpu.trace_start"() <{level = 10 : i32, message = "bqk,bkd->bqd"}> : () -> ()
    %cst_43 = arith.constant dense<0.000000e+00> : vector<2x8x8xf32>
    %130 = tpu.matmul %129, %116, %cst_43 {dimension_numbers = #tpu.dot_dimension_numbers<[2], [1], [1], [2], [0, 0, 0, 1, 1, 2], [0], [0]>} : vector<2x8x8xbf16>, vector<2x8x8xbf16>, vector<2x8x8xf32> -> vector<2x8x8xf32>
    "tpu.trace_stop"() : () -> ()
    %c0_44 = arith.constant 0 : index
    %c0_45 = arith.constant 0 : index
    %c32 = arith.constant 32 : index
    %131 = vector.load %arg11[%c0_44, %c0_45, %c32] : memref<2x8x64xf32, #tpu.memory_space<vmem>>, vector<2x8x8xf32>
    tpu.vector_store %arg11[%c0_44, %c0_45, %c32], %130 {strides = array<i32>} : memref<2x8x64xf32, #tpu.memory_space<vmem>>, vector<2x8x8xf32>,
    %132 = vector.extract_strided_slice %30 {offsets = [0, 0, 40], sizes = [2, 8, 8], strides = [1, 1, 1]} : vector<2x8x128xbf16> to vector<2x8x8xbf16>
    %133 = vector.extract_strided_slice %30 {offsets = [0, 0, 104], sizes = [2, 8, 8], strides = [1, 1, 1]} : vector<2x8x128xbf16> to vector<2x8x8xbf16>
    %134 = vector.extract_strided_slice %32 {offsets = [0, 0, 40], sizes = [2, 8, 8], strides = [1, 1, 1]} : vector<2x8x64xbf16> to vector<2x8x8xbf16>
    "tpu.trace_start"() <{level = 10 : i32, message = "bqd,bkd->bqk"}> : () -> ()
    %cst_46 = arith.constant dense<0.000000e+00> : vector<2x8x8xf32>
    %135 = tpu.matmul %132, %133, %cst_46 {dimension_numbers = #tpu.dot_dimension_numbers<[2], [2], [1], [1], [0, 0, 0, 1, 1, 1], [0], [0]>} : vector<2x8x8xbf16>, vector<2x8x8xbf16>, vector<2x8x8xf32> -> vector<2x8x8xf32>
    "tpu.trace_stop"() : () -> ()
    %136 = arith.addf %135, %41 : vector<2x8x8xf32>
    %cst_47 = arith.constant dense<0xFF800000> : vector<2x8xf32>
    %137 = vector.multi_reduction <maximumf>, %136, %cst_47 [2] : vector<2x8x8xf32> to vector<2x8xf32>
    %138 = vector.shape_cast %137 : vector<2x8xf32> to vector<2x8x1xf32>
    %139 = vector.broadcast %138 : vector<2x8x1xf32> to vector<2x8x8xf32>
    %140 = arith.subf %136, %139 : vector<2x8x8xf32>
    %141 = math.exp %140 : vector<2x8x8xf32>
    %cst_48 = arith.constant dense<0.000000e+00> : vector<2x8xf32>
    %142 = vector.multi_reduction <add>, %141, %cst_48 [2] : vector<2x8x8xf32> to vector<2x8xf32>
    %143 = vector.shape_cast %142 : vector<2x8xf32> to vector<2x8x1xf32>
    %144 = tpu.reciprocal %143 {approx = true} : vector<2x8x1xf32> -> vector<2x8x1xf32>
    %145 = vector.broadcast %144 : vector<2x8x1xf32> to vector<2x8x8xf32>
    %146 = arith.mulf %141, %145 : vector<2x8x8xf32>
    %147 = arith.truncf %146 : vector<2x8x8xf32> to vector<2x8x8xbf16>
    "tpu.trace_start"() <{level = 10 : i32, message = "bqk,bkd->bqd"}> : () -> ()
    %cst_49 = arith.constant dense<0.000000e+00> : vector<2x8x8xf32>
    %148 = tpu.matmul %147, %134, %cst_49 {dimension_numbers = #tpu.dot_dimension_numbers<[2], [1], [1], [2], [0, 0, 0, 1, 1, 2], [0], [0]>} : vector<2x8x8xbf16>, vector<2x8x8xbf16>, vector<2x8x8xf32> -> vector<2x8x8xf32>
    "tpu.trace_stop"() : () -> ()
    %c0_50 = arith.constant 0 : index
    %c0_51 = arith.constant 0 : index
    %c40 = arith.constant 40 : index
    %149 = vector.load %arg11[%c0_50, %c0_51, %c40] : memref<2x8x64xf32, #tpu.memory_space<vmem>>, vector<2x8x8xf32>
    tpu.vector_store %arg11[%c0_50, %c0_51, %c40], %148 {strides = array<i32>} : memref<2x8x64xf32, #tpu.memory_space<vmem>>, vector<2x8x8xf32>,
    %150 = vector.extract_strided_slice %30 {offsets = [0, 0, 48], sizes = [2, 8, 8], strides = [1, 1, 1]} : vector<2x8x128xbf16> to vector<2x8x8xbf16>
    %151 = vector.extract_strided_slice %30 {offsets = [0, 0, 112], sizes = [2, 8, 8], strides = [1, 1, 1]} : vector<2x8x128xbf16> to vector<2x8x8xbf16>
    %152 = vector.extract_strided_slice %32 {offsets = [0, 0, 48], sizes = [2, 8, 8], strides = [1, 1, 1]} : vector<2x8x64xbf16> to vector<2x8x8xbf16>
    "tpu.trace_start"() <{level = 10 : i32, message = "bqd,bkd->bqk"}> : () -> ()
    %cst_52 = arith.constant dense<0.000000e+00> : vector<2x8x8xf32>
    %153 = tpu.matmul %150, %151, %cst_52 {dimension_numbers = #tpu.dot_dimension_numbers<[2], [2], [1], [1], [0, 0, 0, 1, 1, 1], [0], [0]>} : vector<2x8x8xbf16>, vector<2x8x8xbf16>, vector<2x8x8xf32> -> vector<2x8x8xf32>
    "tpu.trace_stop"() : () -> ()
    %154 = arith.addf %153, %41 : vector<2x8x8xf32>
    %cst_53 = arith.constant dense<0xFF800000> : vector<2x8xf32>
    %155 = vector.multi_reduction <maximumf>, %154, %cst_53 [2] : vector<2x8x8xf32> to vector<2x8xf32>
    %156 = vector.shape_cast %155 : vector<2x8xf32> to vector<2x8x1xf32>
    %157 = vector.broadcast %156 : vector<2x8x1xf32> to vector<2x8x8xf32>
    %158 = arith.subf %154, %157 : vector<2x8x8xf32>
    %159 = math.exp %158 : vector<2x8x8xf32>
    %cst_54 = arith.constant dense<0.000000e+00> : vector<2x8xf32>
    %160 = vector.multi_reduction <add>, %159, %cst_54 [2] : vector<2x8x8xf32> to vector<2x8xf32>
    %161 = vector.shape_cast %160 : vector<2x8xf32> to vector<2x8x1xf32>
    %162 = tpu.reciprocal %161 {approx = true} : vector<2x8x1xf32> -> vector<2x8x1xf32>
    %163 = vector.broadcast %162 : vector<2x8x1xf32> to vector<2x8x8xf32>
    %164 = arith.mulf %159, %163 : vector<2x8x8xf32>
    %165 = arith.truncf %164 : vector<2x8x8xf32> to vector<2x8x8xbf16>
    "tpu.trace_start"() <{level = 10 : i32, message = "bqk,bkd->bqd"}> : () -> ()
    %cst_55 = arith.constant dense<0.000000e+00> : vector<2x8x8xf32>
    %166 = tpu.matmul %165, %152, %cst_55 {dimension_numbers = #tpu.dot_dimension_numbers<[2], [1], [1], [2], [0, 0, 0, 1, 1, 2], [0], [0]>} : vector<2x8x8xbf16>, vector<2x8x8xbf16>, vector<2x8x8xf32> -> vector<2x8x8xf32>
    "tpu.trace_stop"() : () -> ()
    %c0_56 = arith.constant 0 : index
    %c0_57 = arith.constant 0 : index
    %c48 = arith.constant 48 : index
    %167 = vector.load %arg11[%c0_56, %c0_57, %c48] : memref<2x8x64xf32, #tpu.memory_space<vmem>>, vector<2x8x8xf32>
    tpu.vector_store %arg11[%c0_56, %c0_57, %c48], %166 {strides = array<i32>} : memref<2x8x64xf32, #tpu.memory_space<vmem>>, vector<2x8x8xf32>,
    %168 = vector.extract_strided_slice %30 {offsets = [0, 0, 56], sizes = [2, 8, 8], strides = [1, 1, 1]} : vector<2x8x128xbf16> to vector<2x8x8xbf16>
    %169 = vector.extract_strided_slice %30 {offsets = [0, 0, 120], sizes = [2, 8, 8], strides = [1, 1, 1]} : vector<2x8x128xbf16> to vector<2x8x8xbf16>
    %170 = vector.extract_strided_slice %32 {offsets = [0, 0, 56], sizes = [2, 8, 8], strides = [1, 1, 1]} : vector<2x8x64xbf16> to vector<2x8x8xbf16>
    "tpu.trace_start"() <{level = 10 : i32, message = "bqd,bkd->bqk"}> : () -> ()
    %cst_58 = arith.constant dense<0.000000e+00> : vector<2x8x8xf32>
    %171 = tpu.matmul %168, %169, %cst_58 {dimension_numbers = #tpu.dot_dimension_numbers<[2], [2], [1], [1], [0, 0, 0, 1, 1, 1], [0], [0]>} : vector<2x8x8xbf16>, vector<2x8x8xbf16>, vector<2x8x8xf32> -> vector<2x8x8xf32>
    "tpu.trace_stop"() : () -> ()
    %172 = arith.addf %171, %41 : vector<2x8x8xf32>
    %cst_59 = arith.constant dense<0xFF800000> : vector<2x8xf32>
    %173 = vector.multi_reduction <maximumf>, %172, %cst_59 [2] : vector<2x8x8xf32> to vector<2x8xf32>
    %174 = vector.shape_cast %173 : vector<2x8xf32> to vector<2x8x1xf32>
    %175 = vector.broadcast %174 : vector<2x8x1xf32> to vector<2x8x8xf32>
    %176 = arith.subf %172, %175 : vector<2x8x8xf32>
    %177 = math.exp %176 : vector<2x8x8xf32>
    %cst_60 = arith.constant dense<0.000000e+00> : vector<2x8xf32>
    %178 = vector.multi_reduction <add>, %177, %cst_60 [2] : vector<2x8x8xf32> to vector<2x8xf32>
    %179 = vector.shape_cast %178 : vector<2x8xf32> to vector<2x8x1xf32>
    %180 = tpu.reciprocal %179 {approx = true} : vector<2x8x1xf32> -> vector<2x8x1xf32>
    %181 = vector.broadcast %180 : vector<2x8x1xf32> to vector<2x8x8xf32>
    %182 = arith.mulf %177, %181 : vector<2x8x8xf32>
    %183 = arith.truncf %182 : vector<2x8x8xf32> to vector<2x8x8xbf16>
    "tpu.trace_start"() <{level = 10 : i32, message = "bqk,bkd->bqd"}> : () -> ()
    %cst_61 = arith.constant dense<0.000000e+00> : vector<2x8x8xf32>
    %184 = tpu.matmul %183, %170, %cst_61 {dimension_numbers = #tpu.dot_dimension_numbers<[2], [1], [1], [2], [0, 0, 0, 1, 1, 2], [0], [0]>} : vector<2x8x8xbf16>, vector<2x8x8xbf16>, vector<2x8x8xf32> -> vector<2x8x8xf32>
    "tpu.trace_stop"() : () -> ()
    %c0_62 = arith.constant 0 : index
    %c0_63 = arith.constant 0 : index
    %c56 = arith.constant 56 : index
    %185 = vector.load %arg11[%c0_62, %c0_63, %c56] : memref<2x8x64xf32, #tpu.memory_space<vmem>>, vector<2x8x8xf32>
    tpu.vector_store %arg11[%c0_62, %c0_63, %c56], %184 {strides = array<i32>} : memref<2x8x64xf32, #tpu.memory_space<vmem>>, vector<2x8x8xf32>,
    %c0_64 = arith.constant 0 : index
    %c0_65 = arith.constant 0 : index
    %c0_66 = arith.constant 0 : index
    %186 = vector.load %arg11[%c0_64, %c0_65, %c0_66] : memref<2x8x64xf32, #tpu.memory_space<vmem>>, vector<2x8x64xf32>
    %187 = vector.shape_cast %186 : vector<2x8x64xf32> to vector<16x64xf32>
    %188 = arith.truncf %187 : vector<16x64xf32> to vector<16x64xbf16>
    %c0_67 = arith.constant 0 : index
    %c0_68 = arith.constant 0 : index
    %189 = vector.load %arg7[%c0_67, %c0_68] : memref<64x64xbf16, #tpu.memory_space<vmem>>, vector<64x64xbf16>
    %cst_69 = arith.constant dense<0.000000e+00> : vector<16x64xf32>
    %190 = tpu.matmul %188, %189, %cst_69 {dimension_numbers = #tpu.dot_dimension_numbers<[1], [0], [0], [1], [0, 0, 1, 1], [], []>} : vector<16x64xbf16>, vector<64x64xbf16>, vector<16x64xf32> -> vector<16x64xf32>
    %191 = arith.addf %1, %190 : vector<16x64xf32>
    %192 = arith.mulf %191, %191 : vector<16x64xf32>
    %cst_70 = arith.constant dense<0.000000e+00> : vector<16xf32>
    %193 = vector.multi_reduction <add>, %192, %cst_70 [1] : vector<16x64xf32> to vector<16xf32>
    %194 = vector.shape_cast %193 : vector<16xf32> to vector<16x1xf32>
    %cst_71 = arith.constant 6.400000e+01 : f32
    %195 = vector.broadcast %cst_71 : f32 to vector<16x1xf32>
    %196 = arith.divf %194, %195 : vector<16x1xf32>
    %cst_72 = arith.constant 9.99999974E-6 : f32
    %197 = vector.broadcast %cst_72 : f32 to vector<16x1xf32>
    %198 = arith.addf %196, %197 : vector<16x1xf32>
    %199 = math.rsqrt %198 : vector<16x1xf32>
    %200 = vector.broadcast %199 : vector<16x1xf32> to vector<16x64xf32>
    %201 = arith.mulf %191, %200 : vector<16x64xf32>
    %c0_73 = arith.constant 0 : index
    %c0_74 = arith.constant 0 : index
    %202 = vector.load %arg5[%c0_73, %c0_74] : memref<1x64xf32, #tpu.memory_space<vmem>>, vector<1x64xf32>
    %203 = vector.broadcast %202 : vector<1x64xf32> to vector<16x64xf32>
    %204 = arith.mulf %201, %203 : vector<16x64xf32>
    %205 = arith.truncf %204 : vector<16x64xf32> to vector<16x64xbf16>
    %c0_75 = arith.constant 0 : index
    %c0_76 = arith.constant 0 : index
    %206 = vector.load %arg8[%c0_75, %c0_76] : memref<64x384xbf16, #tpu.memory_space<vmem>>, vector<64x384xbf16>
    %cst_77 = arith.constant dense<0.000000e+00> : vector<16x384xf32>
    %207 = tpu.matmul %205, %206, %cst_77 {dimension_numbers = #tpu.dot_dimension_numbers<[1], [0], [0], [1], [0, 0, 1, 1], [], []>} : vector<16x64xbf16>, vector<64x384xbf16>, vector<16x384xf32> -> vector<16x384xf32>
    %208 = vector.extract_strided_slice %207 {offsets = [0, 0], sizes = [16, 192], strides = [1, 1]} : vector<16x384xf32> to vector<16x192xf32>
    %209 = vector.extract_strided_slice %207 {offsets = [0, 192], sizes = [16, 192], strides = [1, 1]} : vector<16x384xf32> to vector<16x192xf32>
    %210 = arith.negf %208 : vector<16x192xf32>
    %211 = math.exp %210 : vector<16x192xf32>
    %cst_78 = arith.constant 1.000000e+00 : f32
    %212 = vector.broadcast %cst_78 : f32 to vector<16x192xf32>
    %213 = arith.addf %212, %211 : vector<16x192xf32>
    %214 = arith.divf %212, %213 : vector<16x192xf32>
    %215 = arith.mulf %208, %214 : vector<16x192xf32>
    %216 = arith.mulf %215, %209 : vector<16x192xf32>
    %217 = arith.truncf %216 : vector<16x192xf32> to vector<16x192xbf16>
    %c0_79 = arith.constant 0 : index
    %c0_80 = arith.constant 0 : index
    %218 = vector.load %arg9[%c0_79, %c0_80] : memref<192x64xbf16, #tpu.memory_space<vmem>>, vector<192x64xbf16>
    %cst_81 = arith.constant dense<0.000000e+00> : vector<16x64xf32>
    %219 = tpu.matmul %217, %218, %cst_81 {dimension_numbers = #tpu.dot_dimension_numbers<[1], [0], [0], [1], [0, 0, 1, 1], [], []>} : vector<16x192xbf16>, vector<192x64xbf16>, vector<16x64xf32> -> vector<16x64xf32>
    %220 = arith.addf %191, %219 : vector<16x64xf32>
    %221 = vector.shape_cast %220 : vector<16x64xf32> to vector<2x8x64xf32>
    %c0_82 = arith.constant 0 : index
    %c0_83 = arith.constant 0 : index
    %c0_84 = arith.constant 0 : index
    %222 = vector.load %arg10[%c0_82, %c0_83, %c0_84] : memref<2x8x64xf32, #tpu.memory_space<vmem>>, vector<2x8x64xf32>
    tpu.vector_store %arg10[%c0_82, %c0_83, %c0_84], %221 {strides = array<i32>} : memref<2x8x64xf32, #tpu.memory_space<vmem>>, vector<2x8x64xf32>,
    return
  }
  func.func @transform_0(%arg0: i32) -> (i32, i32, i32) {
    %c0_i32 = arith.constant 0 : i32
    %c0_i32_0 = arith.constant 0 : i32
    %c0_i32_1 = arith.constant 0 : i32
    return %arg0, %c0_i32, %c0_i32_0 : i32, i32, i32
  }
  func.func @transform_1(%arg0: i32) -> (i32, i32) {
    %c0_i32 = arith.constant 0 : i32
    %c0_i32_0 = arith.constant 0 : i32
    %c0_i32_1 = arith.constant 0 : i32
    return %c0_i32, %c0_i32_0 : i32, i32
  }
  func.func @transform_2(%arg0: i32) -> (i32, i32) {
    %c0_i32 = arith.constant 0 : i32
    %c0_i32_0 = arith.constant 0 : i32
    %c0_i32_1 = arith.constant 0 : i32
    return %c0_i32, %c0_i32_0 : i32, i32
  }
  func.func @transform_3(%arg0: i32) -> (i32, i32) {
    %c0_i32 = arith.constant 0 : i32
    %c0_i32_0 = arith.constant 0 : i32
    %c0_i32_1 = arith.constant 0 : i32
    return %c0_i32, %c0_i32_0 : i32, i32
  }
  func.func @transform_4(%arg0: i32) -> (i32, i32) {
    %c0_i32 = arith.constant 0 : i32
    %c0_i32_0 = arith.constant 0 : i32
    %c0_i32_1 = arith.constant 0 : i32
    return %c0_i32, %c0_i32_0 : i32, i32
  }
  func.func @transform_5(%arg0: i32) -> (i32, i32) {
    %c0_i32 = arith.constant 0 : i32
    %c0_i32_0 = arith.constant 0 : i32
    %c0_i32_1 = arith.constant 0 : i32
    return %c0_i32, %c0_i32_0 : i32, i32
  }
  func.func @transform_6(%arg0: i32) -> (i32, i32) {
    %c0_i32 = arith.constant 0 : i32
    %c0_i32_0 = arith.constant 0 : i32
    %c0_i32_1 = arith.constant 0 : i32
    return %c0_i32, %c0_i32_0 : i32, i32
  }
  func.func @transform_7(%arg0: i32) -> (i32, i32) {
    %c0_i32 = arith.constant 0 : i32
    %c0_i32_0 = arith.constant 0 : i32
    %c0_i32_1 = arith.constant 0 : i32
    return %c0_i32, %c0_i32_0 : i32, i32
  }
  func.func @transform_8(%arg0: i32) -> (i32, i32) {
    %c0_i32 = arith.constant 0 : i32
    %c0_i32_0 = arith.constant 0 : i32
    %c0_i32_1 = arith.constant 0 : i32
    return %c0_i32, %c0_i32_0 : i32, i32
  }
  func.func @transform_9(%arg0: i32) -> (i32, i32, i32) {
    %c0_i32 = arith.constant 0 : i32
    %c0_i32_0 = arith.constant 0 : i32
    %c0_i32_1 = arith.constant 0 : i32
    return %arg0, %c0_i32, %c0_i32_0 : i32, i32, i32
  }
}

</mosaic_0001>

<bundles_post_ra>
// kernel: tpu_custom_call.1
= control target key start
LH: loop header
LB: loop body
LE: loop exit
PB: predicated region body
PF: predicated region fallthrough
CT: control target
= control target key end

     0   :  { %14 = vsyncpa [#allocation4], 0  ;;  %s3826_s0 = inlined_call_operand.vmem [shape: f32[2,8,64], index: 0, kind: input, shape index: {}]   ;;  %s3827_s1 = inlined_call_operand.vmem [shape: f32[8,128], index: 1, kind: input, shape index: {}]   ;;  %s3828_s2 = inlined_call_operand.vmem [shape: f32[8,128], index: 2, kind: input, shape index: {}]   ;;  %s3829_s3 = inlined_call_operand.vmem [shape: f32[1,64], index: 3, kind: input, shape index: {}]   ;;  %s3830_s4 = inlined_call_operand.vmem [shape: f32[1,64], index: 4, kind: input, shape index: {}]   ;;  %s3831_s5 = inlined_call_operand.vmem [shape: bf16[64,320], index: 5, kind: input, shape index: {}]   ;;  %s3832_s6 = inlined_call_operand.vmem [shape: bf16[64,64], index: 6, kind: input, shape index: {}]   ;;  %s3833_s7 = inlined_call_operand.hbm [shape: bf16[64,384], index: 7, kind: input, shape index: {}]   ;;  %s3834_s8 = inlined_call_operand.vmem [shape: bf16[192,64], index: 8, kind: input, shape index: {}]   ;;  %s3835_s9 = inlined_call_operand.hbm [shape: f32[2,8,64], index: 9, kind: output, shape index: {}]  }
   0x1   :  { %15 = vsyncpa [#allocation5], 0  ;;  %s3188_s30 = smov [#allocation3]   ;;  %s3140_s13 = scalar_lea.hbm %s3833_s7, 1536 }
   0x2   :  { %s35_s10 = sshll.u32 %s3188_s30, 4  ;;  %p3141_p0 = scmp.ne.s32.totalorder %s3833_s7, %s3140_s13  ;;  %s36_s10 = int_to_ptr.vmem [resolvable:$true] %s35_s10 }
   0x3   :  { %p3144_p1 = scmp.lt.u32.totalorder %s3140_s13, %s3833_s7 }
   0x5   :  { %p3146_p2 = pnand %p3144_p1, %p3141_p0 }
   0x7   :  { %3149 = shalt.err (!%p3146_p2)
}
   0x8   :  { %s3150_s18 = scalar_lea.vmem %s36_s10, 1536  ;;  %p3155_p4 = scmp.lt.s32.totalorder %s36_s10, %s36_s10 }
   0x9   :  { %p3151_p3 = scmp.ne.s32.totalorder %s36_s10, %s3150_s18  ;;  %p3156_p5 = scmp.lt.s32.totalorder %s3150_s18, %s3150_s18 }
   0xb   :  { %p3157_p6 = por %p3156_p5, %p3155_p4 }
   0xd   :  { %p3158_p7 = pnand %p3157_p6, %p3151_p3 }
   0xf   :  { %3161 = shalt.err (!%p3158_p7)
}
  0x10   :  { %s3189_s19 = smov 192   ;;  %s3190_s20 = smov 12  }
  0x11   :  { %41 = dma.hbm_to_vmem [thread:$0]  %s3833_s7, 1536, %s36_s10, [#allocation4], %s3189_s19, %s3189_s19, %s3190_s20  }
  0x12   :  { %3184 = dma.done.wait [#allocation4], 1536  }
  0x13   :  { %3185 = vsyncadd [#allocation4], 4294965760  ;;  %v48_v0 = vld [vmem:[%s3826_s0] sm:$0xff]  ;;  %vm52_vm0 = vcmask 523264   ;;  %v49_v1 = vld [vmem:[%s3826_s0 + $0x8] sm:$0xff]  ;;  %v3191_v11 = vmov 0   ;;  %v257_v60 = vlaneseq }
  0x14   :  { %v50_v2 = vmul.f32 %v48_v0, %v48_v0  ;;  %v51_v3 = vmul.f32 %v49_v1, %v49_v1  ;;  %v3002_v6 = vld [vmem:[%s3831_s5 + $0x4] ss:$12 sps:$4 sm:$0xff]   ;;  %v3004_v7 = vld [vmem:[%s3831_s5] ss:$12 sps:$4 sm:$0xff]   ;;  %v3005_v8 = vld [vmem:[%s3831_s5 + $0x1c] ss:$12 sps:$4 sm:$0xff]   ;;  %193 = vmatprep.mubr.bf16.mxu0 %v3191_v11 }
  0x15   :  { %161 = vmatprep.subr.bf16.mxu0 %v3002_v6  ;;  %v3007_v9 = vld [vmem:[%s3831_s5 + $0x18] ss:$12 sps:$4 sm:$0xff]   ;;  %v3008_v10 = vld [vmem:[%s3831_s5 + $0x34] ss:$12 sps:$4 sm:$0xff]   ;;  %v3192_v12 = vmov 0.0   ;;  %vm3193_vm1 = vmmov 0  }
  0x16   :  { %v53_v4 = vsel %vm52_vm0, %v50_v2, 0.0  ;;  %v56_v5 = vsel %vm52_vm0, %v51_v3, 0.0  ;;  %162 = vmatpush1.bf16.msra.mxu0 %v3004_v7  ;;  %2768 = vmatprep.subr.bf16.mxu1 %v3192_v12  ;;  %v3010_v13 = vld [vmem:[%s3831_s5 + $0x30] ss:$12 sps:$4 sm:$0xff]   ;;  %v3011_v14 = vld [vmem:[%s3831_s5 + $0x4c] ss:$12 sps:$4 sm:$0xff]  }
  0x17   :  { %54 = vadd.xlane.f32.xlu0 %v53_v4  ;;  %163 = vmatprep.subr.bf16.mxu0 %v3005_v8  ;;  %v3013_v15 = vld [vmem:[%s3831_s5 + $0x48] ss:$12 sps:$4 sm:$0xff]   ;;  %v2587_v25 = vld [vmem:[%s3829_s3] ss:$0 sm:$0xff]  ;;  %v3016_v32 = vld [vmem:[%s3831_s5 + $0x38] ss:$12 sps:$4 sm:$0xff]  }
  0x18   :  { %2770 = vmatprep.mubr.msk.bf16.mxu1 %vm3193_vm1, %v3192_v12  ;;  %v3014_v29 = vld [vmem:[%s3831_s5 + $0x8] ss:$12 sps:$4 sm:$0xff]   ;;  %v3015_v31 = vld [vmem:[%s3831_s5 + $0x20] ss:$12 sps:$4 sm:$0xff]   ;;  %v3017_v33 = vld [vmem:[%s3831_s5 + $0x50] ss:$12 sps:$4 sm:$0xff]  }
  0x19   :  { %v245_v34 = vld [vmem:[%s3827_s1] sm:$0xff]  ;;  %s3194_s5 = smov 64   ;;  %vm266_vm2 = vcmask 64512   ;;  %vm389_vm3 = vcmask 1043456   ;;  %v258_v61 = vshrl.u32 %v257_v60, 7  ;;  %v260_v62 = vand.u32 127, %v257_v60 }
  0x1a   :  { %164 = vmatpush1.bf16.msra.mxu0 %v3007_v9  ;;  %v248_v35 = vld [vmem:[%s3828_s2] sm:$0xff]  ;;  %v3195_v63 = vmov -1e+30   ;;  %s3196_s1 = smov 120   ;;  %s3197_s2 = smov 56   ;;  %vm711_vm5 = vcmask 130112  }
  0x1b   :  { %57 = vadd.xlane.f32.xlu0 %v56_v5  ;;  %165 = vmatprep.subr.bf16.mxu0 %v3008_v10  ;;  %vm261_vm4 = vcmp.le.s32.totalorder %v260_v62, %v258_v61  ;;  %s3198_s12 = smov 48   ;;  %s3199_s13 = smov 112   ;;  %vm942_vm6 = vcmask 195712   ;;  %vm1173_vm7 = vcmask 261312   ;;  %vm1404_vm8 = vcmask 326912  }
  0x1c   :  { %s3200_s14 = smov 40   ;;  %s3201_s15 = smov 104   ;;  %vm1635_vm9 = vcmask 392512   ;;  %vm1866_vm10 = vcmask 458112   ;;  %vm2097_vm11 = vcmask 523712  }
  0x1d   :  { %s3202_s16 = smov 32   ;;  %s3203_s17 = smov 96  }
  0x1e   :  { %166 = vmatpush1.bf16.msra.mxu0 %v3010_v13  ;;  %s3204_s18 = smov 24   ;;  %s3205_s19 = smov 88  }
  0x1f   :  { %167 = vmatprep.subr.bf16.mxu0 %v3011_v14  ;;  %s3206_s20 = smov 16   ;;  %s3207_s21 = smov 80  }
  0x20   :  { %s3208_s22 = smov 8   ;;  %s3209_s23 = smov 72  }
  0x22   :  { %168 = vmatpush1.bf16.msra.mxu0 %v3013_v15 }
  0x23   :  { %2750 = vmatprep.subr.bf16.mxu0 %v3192_v12 }
  0xa4   :  { %v55_v16 = vpop.xlane.xlu0 %54 }
  0xa5   :  { %v60_v17 = vmul.f32 0.015625, %v55_v16 }
  0xa7   :  { %v62_v18 = vadd.f32 1e-05, %v60_v17 }
  0xa8   :  { %v58_v19 = vpop.xlane.xlu0 %57 }
  0xa9   :  { %3050 = vrsqrt.f32 %v62_v18  ;;  %v61_v20 = vmul.f32 0.015625, %v58_v19 }
  0xab   :  { %v63_v21 = vadd.f32 1e-05, %v61_v20 }
  0xad   :  { %3052 = vrsqrt.f32 %v63_v21 }
  0xb3   :  { %v3051_v22 = vpop.eup %3050 }
  0xb4   :  { %v66_v23 = vmul.f32 %v3051_v22, %v48_v0  ;;  %v3372_v0 = vsel %vm261_vm4, 0.0, %v3195_v63 }
  0xb6   :  { %v75_v27 = vmul.f32 %v2587_v25, %v66_v23 }
  0xb7   :  { %v3053_v24 = vpop.eup %3052 }
  0xb8   :  { %v67_v26 = vmul.f32 %v3053_v24, %v49_v1 }
  0xba   :  { %v76_v28 = vmul.f32 %v2587_v25, %v67_v26 }
  0xbc   :  { %v77_v30 = vpack.c.bf16 %v76_v28, %v75_v27 }
  0xbe   :  { %2600 = vmatmul.mubr.msk.bf16.vlgmr.msra.gmra.mrb[0].mxu0 %vm52_vm0, %v77_v30 }
  0xbf   :  { %2751 = vmatpush3.bf16.msra.mxu0 %v3014_v29  ;;  %2758 = vmatprep.mubr.msk.bf16.mxu0 %vm3193_vm1, %v3192_v12 }
  0xc0   :  { %2752 = vmatprep.subr.bf16.mxu0 %v3192_v12 }
  0xc3   :  { %2753 = vmatpush3.bf16.msra.mxu0 %v3015_v31 }
  0xc4   :  { %2754 = vmatprep.subr.bf16.mxu0 %v3192_v12 }
  0xc7   :  { %2755 = vmatpush3.bf16.msra.mxu0 %v3016_v32 }
  0xc8   :  { %2756 = vmatprep.subr.bf16.mxu0 %v3192_v12 }
  0xcb   :  { %2757 = vmatpush3.bf16.msra.mxu0 %v3017_v33 }
  0xcc   :  { %2762 = vmatprep.subr.bf16.mxu0 %v3192_v12 }
  0xce   :  { %2759 = vmatmul.mubr.msk.bf16.vlgmr.msra.gmra.mrb[4].mxu0 %vm52_vm0, %v77_v30 }
  0xcf   :  { %2764 = vmatprep.mubr.msk.bf16.mxu0 %vm3193_vm1, %v3192_v12 }
 0x191   :  { %v195_v36 = vpop.f32.mrb[0].mxu0 }
 0x192   :  { %v246_v37 = vmul.f32 %v245_v34, %v195_v36  ;;  %v197_v38 = vpop.f32.mrb[1].mxu0 }
 0x193   :  { %v249_v39 = vmul.f32 %v248_v35, %v197_v38  ;;  %v199_v40 = vpop.f32.mrb[2].mxu0 }
 0x194   :  { %v247_v41 = vmul.f32 %v245_v34, %v199_v40  ;;  %v201_v42 = vpop.f32.mrb[3].mxu0 }
 0x195   :  { %v251_v43 = vadd.f32 %v249_v39, %v246_v37  ;;  %v250_v44 = vmul.f32 %v248_v35, %v201_v42 }
 0x197   :  { %v3342_v45 = vpack.c.bf16 %v251_v43, %v251_v43  ;;  %v252_v46 = vadd.f32 %v250_v44, %v247_v41 }
 0x199   :  { %264 = vrot.lane.b32.xlu1 %v3342_v45, %s3194_s5  ;;  %v3346_v47 = vpack.c.bf16 %v252_v46, %v252_v46 }
 0x19d   :  { %314 = vrot.lane.b32.xlu1 %v3346_v47, %s3194_s5 }
 0x1a1   :  { %v238_v48 = vpop.f32.mrb[4].mxu0 }
 0x1a2   :  { %v2760_v49 = vpop.f32.mrb[5].mxu0  ;;  %v3352_v55 = vpack.c.bf16 %v238_v48, %v238_v48 }
 0x1a3   :  { %v241_v50 = vpop.f32.mrb[6].mxu0 }
 0x1a4   :  { %v2761_v51 = vpop.f32.mrb[7].mxu0  ;;  %v3356_v57 = vpack.c.bf16 %v241_v50, %v241_v50  ;;  %v391_v58 = vsel %vm389_vm3, %v3352_v55, 0 }
 0x1a6   :  { %v437_v59 = vsel %vm389_vm3, %v3356_v57, 0 }
 0x20b   :  { %v265_v52 = vpop.permute.xlu1 %264 }
 0x20c   :  { %v271_v53 = vsel %vm266_vm2, %v265_v52, 0 }
 0x20d   :  { %2763 = vmatpush3.bf16.xpose.msra.mxu0 %v271_v53 }
 0x20e   :  { %2774 = vmatprep.subr.bf16.mxu0 %v3192_v12 }
 0x20f   :  { %v315_v54 = vpop.permute.xlu1 %314 }
 0x210   :  { %v320_v56 = vsel %vm266_vm2, %v315_v54, 0 }
 0x211   :  { %2769 = vmatpush3.bf16.xpose.msra.mxu1 %v320_v56 }
 0x212   :  { %2780 = vmatprep.subr.bf16.mxu1 %v3192_v12 }
 0x214   :  { %2765 = vmatmul.mubr.msk.bf16.vlgmr.msra.gmra.mrb[8].mxu0 %vm266_vm2, %v3342_v45 }
 0x215   :  { %2775 = vmatpush3.bf16.msra.mxu0 %v391_v58  ;;  %2776 = vmatprep.mubr.msk.bf16.mxu0 %vm3193_vm1, %v3192_v12 }
 0x216   :  { %2786 = vmatprep.subr.bf16.mxu0 %v3192_v12 }
 0x218   :  { %2771 = vmatmul.mubr.msk.bf16.vlgmr.msra.gmra.mrb[0].mxu1 %vm266_vm2, %v3346_v47 }
 0x219   :  { %2781 = vmatpush3.bf16.msra.mxu1 %v437_v59  ;;  %2782 = vmatprep.mubr.msk.bf16.mxu1 %vm3193_vm1, %v3192_v12 }
 0x21a   :  { %2792 = vmatprep.subr.bf16.mxu1 %v3192_v12 }
 0x2e7   :  { %v307_v1 = vpop.f32.mrb[8].mxu0 }
 0x2e8   :  { %v308_v2 = vadd.f32 %v307_v1, %v3372_v0  ;;  %v2766_v3 = vpop.f32.mrb[9].mxu0 }
 0x2e9   :  { %v310_v4 = vpop.f32.mrb[10].mxu0 }
 0x2ea   :  { %v2767_v5 = vpop.f32.mrb[11].mxu0  ;;  %v362_v6 = vsel %vm266_vm2, %v308_v2, -inf }
 0x2eb   :  { %v356_v7 = vpop.f32.mrb[0].mxu1  ;;  %363 = vmax.xlane.f32.xlu0 %v362_v6 }
 0x2ec   :  { %v357_v8 = vadd.f32 %v356_v7, %v3372_v0  ;;  %v2772_v9 = vpop.f32.mrb[1].mxu1 }
 0x2ed   :  { %v359_v10 = vpop.f32.mrb[2].mxu1 }
 0x2ee   :  { %v2773_v13 = vpop.f32.mrb[3].mxu1  ;;  %v365_v14 = vsel %vm266_vm2, %v357_v8, -inf }
 0x2ef   :  { %366 = vmax.xlane.f32.xlu1 %v365_v14 }
 0x300   :  { %481 = vrot.lane.b32.xlu1 %v3342_v45, %s3196_s1 }
 0x301   :  { %483 = vrot.lane.b32.xlu0 %v3342_v45, %s3197_s2 }
 0x378   :  { %v364_v15 = vpop.xlane.xlu0 %363 }
 0x379   :  { %v368_v16 = vsub.f32 %v308_v2, %v364_v15 }
 0x37b   :  { %v370_v17 = vmul.f32 1.442695, %v368_v16 }
 0x37c   :  { %v367_v18 = vpop.xlane.xlu1 %366  ;;  %v484_v25 = vpop.permute.xlu0 %483 }
 0x37d   :  { %3054 = vpow2.f32 %v370_v17  ;;  %v369_v19 = vsub.f32 %v357_v8, %v367_v18  ;;  %v489_v32 = vsel %vm266_vm2, %v484_v25, 0 }
 0x37f   :  { %v372_v20 = vmul.f32 1.442695, %v369_v19 }
 0x380   :  { %v482_v37 = vpop.permute.xlu1 %481 }
 0x381   :  { %3056 = vpow2.f32 %v372_v20 }
 0x387   :  { %v3055_v21 = vpop.eup %3054 }
 0x388   :  { %v374_v22 = vsel %vm266_vm2, %v3055_v21, 0.0 }
 0x389   :  { %375 = vadd.xlane.f32.xlu0 %v374_v22 }
 0x38b   :  { %v3057_v23 = vpop.eup %3056 }
 0x38c   :  { %v377_v24 = vsel %vm266_vm2, %v3057_v23, 0.0 }
 0x38d   :  { %378 = vadd.xlane.f32.xlu0 %v377_v24 }
 0x3a3   :  { %533 = vrot.lane.b32.xlu0 %v3346_v47, %s3197_s2 }
 0x3a7   :  { %531 = vrot.lane.b32.xlu0 %v3346_v47, %s3196_s1 }
 0x416   :  { %v376_v26 = vpop.xlane.xlu0 %375 }
 0x417   :  { %3058 = vrcp.f32 %v376_v26 }
 0x41a   :  { %v379_v27 = vpop.xlane.xlu0 %378 }
 0x41b   :  { %3060 = vrcp.f32 %v379_v27 }
 0x41e   :  { %v534_v34 = vpop.permute.xlu0 %533 }
 0x41f   :  { %v539_v36 = vsel %vm266_vm2, %v534_v34, 0 }
 0x421   :  { %v3059_v28 = vpop.eup %3058 }
 0x422   :  { %v382_v29 = vmul.f32 %v3059_v28, %v3055_v21  ;;  %v532_v38 = vpop.permute.xlu0 %531 }
 0x424   :  { %v384_v30 = vpack.c.bf16 %v382_v29, %v382_v29 }
 0x425   :  { %v3061_v31 = vpop.eup %3060 }
 0x426   :  { %v383_v33 = vmul.f32 %v3061_v31, %v3057_v23  ;;  %2777 = vmatmul.mubr.msk.bf16.vlgmr.msra.gmra.mrb[12].mxu0 %vm266_vm2, %v384_v30 }
 0x427   :  { %2787 = vmatpush3.bf16.xpose.msra.mxu0 %v489_v32  ;;  %2788 = vmatprep.mubr.msk.bf16.mxu0 %vm3193_vm1, %v3192_v12 }
 0x428   :  { %v385_v35 = vpack.c.bf16 %v383_v33, %v383_v33  ;;  %2798 = vmatprep.subr.bf16.mxu0 %v3192_v12 }
 0x42a   :  { %2783 = vmatmul.mubr.msk.bf16.vlgmr.msra.gmra.mrb[4].mxu1 %vm266_vm2, %v385_v35 }
 0x42b   :  { %2793 = vmatpush3.bf16.xpose.msra.mxu1 %v539_v36  ;;  %2794 = vmatprep.mubr.msk.bf16.mxu1 %vm3193_vm1, %v3192_v12 }
 0x42c   :  { %2804 = vmatprep.subr.bf16.mxu1 %v3192_v12 }
 0x42e   :  { %2789 = vmatmul.mubr.msk.bf16.vlgmr.msra.gmra.mrb[16].mxu0 %vm266_vm2, %v482_v37 }
 0x42f   :  { %2800 = vmatprep.mubr.msk.bf16.mxu0 %vm3193_vm1, %v3192_v12 }
 0x432   :  { %2795 = vmatmul.mubr.msk.bf16.vlgmr.msra.gmra.mrb[8].mxu1 %vm266_vm2, %v532_v38 }
 0x433   :  { %2806 = vmatprep.mubr.msk.bf16.mxu1 %vm3193_vm1, %v3192_v12 }
 0x4f9   :  { %v427_v39 = vpop.f32.mrb[12].mxu0 }
 0x4fa   :  { %479 = vst.msk [vmem:[#allocation2] sm:$0xff] %vm266_vm2, %v427_v39  ;;  %v2778_v40 = vpop.f32.mrb[13].mxu0 }
 0x4fb   :  { %v430_v41 = vpop.f32.mrb[14].mxu0 }
 0x4fc   :  { %v2779_v42 = vpop.f32.mrb[15].mxu0 }
 0x4fd   :  { %v473_v43 = vpop.f32.mrb[4].mxu1 }
 0x4fe   :  { %480 = vst.msk [vmem:[#allocation2 + $0x8] sm:$0xff] %vm266_vm2, %v473_v43  ;;  %v2784_v44 = vpop.f32.mrb[5].mxu1 }
 0x4ff   :  { %v476_v46 = vpop.f32.mrb[6].mxu1 }
 0x500   :  { %v2785_v48 = vpop.f32.mrb[7].mxu1 }
 0x501   :  { %v525_v49 = vpop.f32.mrb[16].mxu0 }
 0x502   :  { %v526_v50 = vadd.f32 %v525_v49, %v3372_v0  ;;  %v2790_v51 = vpop.f32.mrb[17].mxu0 }
 0x503   :  { %v528_v52 = vpop.f32.mrb[18].mxu0 }
 0x504   :  { %v2791_v53 = vpop.f32.mrb[19].mxu0  ;;  %v581_v54 = vsel %vm266_vm2, %v526_v50, -inf }
 0x505   :  { %v575_v56 = vpop.f32.mrb[8].mxu1  ;;  %582 = vmax.xlane.f32.xlu0 %v581_v54 }
 0x506   :  { %v576_v58 = vadd.f32 %v575_v56, %v3372_v0  ;;  %v2796_v59 = vpop.f32.mrb[9].mxu1 }
 0x507   :  { %v578_v60 = vpop.f32.mrb[10].mxu1 }
 0x508   :  { %v2797_v61 = vpop.f32.mrb[11].mxu1  ;;  %v584_v62 = vsel %vm266_vm2, %v576_v58, -inf }
 0x509   :  { %585 = vmax.xlane.f32.xlu1 %v584_v62 }
 0x51a   :  { %655 = vrot.lane.b32.xlu1 %v3356_v57, %s3196_s1 }
 0x51b   :  { %606 = vrot.lane.b32.xlu0 %v3352_v55, %s3196_s1 }
 0x51e   :  { %766 = vrot.lane.b32.xlu1 %v3346_v47, %s3198_s12 }
 0x522   :  { %764 = vrot.lane.b32.xlu1 %v3346_v47, %s3199_s13 }
 0x592   :  { %v583_v63 = vpop.xlane.xlu0 %582 }
 0x593   :  { %v587_v1 = vsub.f32 %v526_v50, %v583_v63 }
 0x595   :  { %v589_v2 = vmul.f32 1.442695, %v587_v1 }
 0x596   :  { %v586_v3 = vpop.xlane.xlu1 %585  ;;  %v607_v4 = vpop.permute.xlu0 %606 }
 0x597   :  { %3062 = vpow2.f32 %v589_v2  ;;  %v588_v5 = vsub.f32 %v576_v58, %v586_v3  ;;  %v612_v6 = vsel %vm389_vm3, %v607_v4, 0 }
 0x598   :  { %2799 = vmatpush3.bf16.msra.mxu0 %v612_v6 }
 0x599   :  { %v591_v7 = vmul.f32 1.442695, %v588_v5  ;;  %2810 = vmatprep.subr.bf16.mxu0 %v3192_v12 }
 0x59a   :  { %v656_v8 = vpop.permute.xlu1 %655 }
 0x59b   :  { %3064 = vpow2.f32 %v591_v7  ;;  %v661_v9 = vsel %vm389_vm3, %v656_v8, 0 }
 0x59c   :  { %2805 = vmatpush3.bf16.msra.mxu1 %v661_v9 }
 0x59d   :  { %2816 = vmatprep.subr.bf16.mxu1 %v3192_v12 }
 0x59e   :  { %v767_v25 = vpop.permute.xlu1 %766 }
 0x59f   :  { %v772_v27 = vsel %vm266_vm2, %v767_v25, 0 }
 0x5a1   :  { %v3063_v10 = vpop.eup %3062 }
 0x5a2   :  { %v593_v13 = vsel %vm266_vm2, %v3063_v10, 0.0  ;;  %v765_v29 = vpop.permute.xlu1 %764 }
 0x5a3   :  { %594 = vadd.xlane.f32.xlu0 %v593_v13 }
 0x5a5   :  { %v3065_v14 = vpop.eup %3064 }
 0x5a6   :  { %v596_v15 = vsel %vm266_vm2, %v3065_v14, 0.0 }
 0x5a7   :  { %597 = vadd.xlane.f32.xlu0 %v596_v15 }
 0x5bd   :  { %716 = vrot.lane.b32.xlu0 %v3342_v45, %s3198_s12 }
 0x5c1   :  { %714 = vrot.lane.b32.xlu0 %v3342_v45, %s3199_s13 }
 0x630   :  { %v595_v16 = vpop.xlane.xlu0 %594 }
 0x631   :  { %3066 = vrcp.f32 %v595_v16 }
 0x634   :  { %v598_v17 = vpop.xlane.xlu0 %597 }
 0x635   :  { %3068 = vrcp.f32 %v598_v17 }
 0x638   :  { %v717_v20 = vpop.permute.xlu0 %716 }
 0x639   :  { %v722_v24 = vsel %vm266_vm2, %v717_v20, 0 }
 0x63b   :  { %v3067_v18 = vpop.eup %3066 }
 0x63c   :  { %v601_v19 = vmul.f32 %v3067_v18, %v3063_v10  ;;  %v715_v28 = vpop.permute.xlu0 %714 }
 0x63e   :  { %v603_v21 = vpack.c.bf16 %v601_v19, %v601_v19 }
 0x63f   :  { %v3069_v22 = vpop.eup %3068 }
 0x640   :  { %v602_v23 = vmul.f32 %v3069_v22, %v3065_v14  ;;  %2801 = vmatmul.mubr.msk.bf16.vlgmr.msra.gmra.mrb[20].mxu0 %vm266_vm2, %v603_v21 }
 0x641   :  { %2811 = vmatpush3.bf16.xpose.msra.mxu0 %v722_v24  ;;  %2812 = vmatprep.mubr.msk.bf16.mxu0 %vm3193_vm1, %v3192_v12 }
 0x642   :  { %v604_v26 = vpack.c.bf16 %v602_v23, %v602_v23  ;;  %2822 = vmatprep.subr.bf16.mxu0 %v3192_v12 }
 0x644   :  { %2807 = vmatmul.mubr.msk.bf16.vlgmr.msra.gmra.mrb[12].mxu1 %vm266_vm2, %v604_v26 }
 0x645   :  { %2817 = vmatpush3.bf16.xpose.msra.mxu1 %v772_v27  ;;  %2818 = vmatprep.mubr.msk.bf16.mxu1 %vm3193_vm1, %v3192_v12 }
 0x646   :  { %2828 = vmatprep.subr.bf16.mxu1 %v3192_v12 }
 0x648   :  { %2813 = vmatmul.mubr.msk.bf16.vlgmr.msra.gmra.mrb[24].mxu0 %vm266_vm2, %v715_v28 }
 0x649   :  { %2824 = vmatprep.mubr.msk.bf16.mxu0 %vm3193_vm1, %v3192_v12 }
 0x64c   :  { %2819 = vmatmul.mubr.msk.bf16.vlgmr.msra.gmra.mrb[16].mxu1 %vm266_vm2, %v765_v29 }
 0x64d   :  { %2830 = vmatprep.mubr.msk.bf16.mxu1 %vm3193_vm1, %v3192_v12 }
 0x713   :  { %v3444_v30 = vpop.f32.mrb[20].mxu0 }
 0x714   :  { %v2802_v31 = vpop.f32.mrb[21].mxu0 }
 0x715   :  { %v651_v32 = vpop.f32.mrb[22].mxu0 }
 0x716   :  { %v2803_v33 = vpop.f32.mrb[23].mxu0 }
 0x717   :  { %v3446_v34 = vpop.f32.mrb[12].mxu1 }
 0x718   :  { %v2808_v35 = vpop.f32.mrb[13].mxu1 }
 0x719   :  { %v700_v36 = vpop.f32.mrb[14].mxu1 }
 0x71a   :  { %v2809_v37 = vpop.f32.mrb[15].mxu1 }
 0x71b   :  { %v758_v38 = vpop.f32.mrb[24].mxu0 }
 0x71c   :  { %v759_v39 = vadd.f32 %v758_v38, %v3372_v0  ;;  %v2814_v40 = vpop.f32.mrb[25].mxu0 }
 0x71d   :  { %v761_v41 = vpop.f32.mrb[26].mxu0 }
 0x71e   :  { %v2815_v42 = vpop.f32.mrb[27].mxu0  ;;  %v814_v43 = vsel %vm266_vm2, %v759_v39, -inf }
 0x71f   :  { %v808_v44 = vpop.f32.mrb[16].mxu1  ;;  %815 = vmax.xlane.f32.xlu0 %v814_v43 }
 0x720   :  { %v809_v46 = vadd.f32 %v808_v44, %v3372_v0  ;;  %v2820_v48 = vpop.f32.mrb[17].mxu1 }
 0x721   :  { %v811_v49 = vpop.f32.mrb[18].mxu1 }
 0x722   :  { %v2821_v50 = vpop.f32.mrb[19].mxu1  ;;  %v817_v51 = vsel %vm266_vm2, %v809_v46, -inf }
 0x723   :  { %818 = vmax.xlane.f32.xlu1 %v817_v51 }
 0x734   :  { %886 = vrot.lane.b32.xlu1 %v3356_v57, %s3199_s13 }
 0x738   :  { %947 = vrot.lane.b32.xlu1 %v3342_v45, %s3200_s14 }
 0x73c   :  { %997 = vrot.lane.b32.xlu1 %v3346_v47, %s3200_s14 }
 0x740   :  { %995 = vrot.lane.b32.xlu1 %v3346_v47, %s3201_s15 }
 0x7ac   :  { %v816_v52 = vpop.xlane.xlu0 %815 }
 0x7ad   :  { %v820_v53 = vsub.f32 %v759_v39, %v816_v52 }
 0x7af   :  { %v822_v54 = vmul.f32 1.442695, %v820_v53 }
 0x7b0   :  { %v819_v56 = vpop.xlane.xlu1 %818 }
 0x7b1   :  { %3070 = vpow2.f32 %v822_v54  ;;  %v821_v58 = vsub.f32 %v809_v46, %v819_v56 }
 0x7b3   :  { %v824_v59 = vmul.f32 1.442695, %v821_v58 }
 0x7b4   :  { %v887_v60 = vpop.permute.xlu1 %886 }
 0x7b5   :  { %3072 = vpow2.f32 %v824_v59  ;;  %v892_v61 = vsel %vm389_vm3, %v887_v60, 0 }
 0x7b6   :  { %2829 = vmatpush3.bf16.msra.mxu1 %v892_v61 }
 0x7b7   :  { %2840 = vmatprep.subr.bf16.mxu1 %v3192_v12 }
 0x7b8   :  { %v948_v8 = vpop.permute.xlu1 %947 }
 0x7b9   :  { %v953_v16 = vsel %vm266_vm2, %v948_v8, 0 }
 0x7bb   :  { %v3071_v62 = vpop.eup %3070 }
 0x7bc   :  { %v826_v63 = vsel %vm266_vm2, %v3071_v62, 0.0  ;;  %v998_v15 = vpop.permute.xlu1 %997 }
 0x7bd   :  { %827 = vadd.xlane.f32.xlu0 %v826_v63  ;;  %v1003_v18 = vsel %vm266_vm2, %v998_v15, 0 }
 0x7bf   :  { %v3073_v1 = vpop.eup %3072 }
 0x7c0   :  { %v829_v2 = vsel %vm266_vm2, %v3073_v1, 0.0  ;;  %v996_v20 = vpop.permute.xlu1 %995 }
 0x7c1   :  { %830 = vadd.xlane.f32.xlu0 %v829_v2 }
 0x7d7   :  { %838 = vrot.lane.b32.xlu0 %v3352_v55, %s3199_s13 }
 0x7db   :  { %945 = vrot.lane.b32.xlu0 %v3342_v45, %s3201_s15 }
 0x84a   :  { %v828_v3 = vpop.xlane.xlu0 %827 }
 0x84b   :  { %3074 = vrcp.f32 %v828_v3 }
 0x84e   :  { %v831_v4 = vpop.xlane.xlu0 %830 }
 0x84f   :  { %3076 = vrcp.f32 %v831_v4 }
 0x852   :  { %v839_v5 = vpop.permute.xlu0 %838 }
 0x853   :  { %v844_v6 = vsel %vm389_vm3, %v839_v5, 0 }
 0x854   :  { %2823 = vmatpush3.bf16.msra.mxu0 %v844_v6 }
 0x855   :  { %v3075_v7 = vpop.eup %3074  ;;  %2834 = vmatprep.subr.bf16.mxu0 %v3192_v12 }
 0x856   :  { %v834_v9 = vmul.f32 %v3075_v7, %v3071_v62  ;;  %v946_v19 = vpop.permute.xlu0 %945 }
 0x858   :  { %v836_v10 = vpack.c.bf16 %v834_v9, %v834_v9 }
 0x859   :  { %v3077_v13 = vpop.eup %3076 }
 0x85a   :  { %v835_v14 = vmul.f32 %v3077_v13, %v3073_v1  ;;  %2825 = vmatmul.mubr.msk.bf16.vlgmr.msra.gmra.mrb[28].mxu0 %vm266_vm2, %v836_v10 }
 0x85b   :  { %2836 = vmatprep.mubr.msk.bf16.mxu0 %vm3193_vm1, %v3192_v12 }
 0x85c   :  { %v837_v17 = vpack.c.bf16 %v835_v14, %v835_v14 }
 0x85d   :  { %2835 = vmatpush3.bf16.xpose.msra.mxu0 %v953_v16 }
 0x85e   :  { %2831 = vmatmul.mubr.msk.bf16.vlgmr.msra.gmra.mrb[20].mxu1 %vm266_vm2, %v837_v17  ;;  %2846 = vmatprep.subr.bf16.mxu0 %v3192_v12 }
 0x85f   :  { %2841 = vmatpush3.bf16.xpose.msra.mxu1 %v1003_v18  ;;  %2842 = vmatprep.mubr.msk.bf16.mxu1 %vm3193_vm1, %v3192_v12 }
 0x860   :  { %2852 = vmatprep.subr.bf16.mxu1 %v3192_v12 }
 0x864   :  { %2837 = vmatmul.mubr.msk.bf16.vlgmr.msra.gmra.mrb[32].mxu0 %vm266_vm2, %v946_v19 }
 0x865   :  { %2848 = vmatprep.mubr.msk.bf16.mxu0 %vm3193_vm1, %v3192_v12 }
 0x866   :  { %2843 = vmatmul.mubr.msk.bf16.vlgmr.msra.gmra.mrb[24].mxu1 %vm266_vm2, %v996_v20 }
 0x867   :  { %2854 = vmatprep.mubr.msk.bf16.mxu1 %vm3193_vm1, %v3192_v12 }
 0x92d   :  { %v3486_v21 = vpop.f32.mrb[28].mxu0 }
 0x92e   :  { %v2826_v22 = vpop.f32.mrb[29].mxu0 }
 0x92f   :  { %v883_v23 = vpop.f32.mrb[30].mxu0 }
 0x930   :  { %v2827_v24 = vpop.f32.mrb[31].mxu0 }
 0x931   :  { %v3488_v25 = vpop.f32.mrb[20].mxu1 }
 0x932   :  { %v2832_v26 = vpop.f32.mrb[21].mxu1 }
 0x933   :  { %v931_v27 = vpop.f32.mrb[22].mxu1 }
 0x934   :  { %v2833_v28 = vpop.f32.mrb[23].mxu1 }
 0x937   :  { %v989_v29 = vpop.f32.mrb[32].mxu0 }
 0x938   :  { %v990_v31 = vadd.f32 %v989_v29, %v3372_v0  ;;  %v2838_v32 = vpop.f32.mrb[33].mxu0 }
 0x939   :  { %v992_v33 = vpop.f32.mrb[34].mxu0  ;;  %v1039_v35 = vpop.f32.mrb[24].mxu1 }
 0x93a   :  { %v1040_v36 = vadd.f32 %v1039_v35, %v3372_v0  ;;  %v2839_v37 = vpop.f32.mrb[35].mxu0  ;;  %v2844_v38 = vpop.f32.mrb[25].mxu1  ;;  %v1045_v39 = vsel %vm266_vm2, %v990_v31, -inf }
 0x93b   :  { %v1042_v40 = vpop.f32.mrb[26].mxu1  ;;  %1046 = vmax.xlane.f32.xlu0 %v1045_v39 }
 0x93c   :  { %v2845_v41 = vpop.f32.mrb[27].mxu1  ;;  %v1048_v42 = vsel %vm266_vm2, %v1040_v36, -inf }
 0x93d   :  { %1049 = vmax.xlane.f32.xlu1 %v1048_v42 }
 0x94e   :  { %1117 = vrot.lane.b32.xlu1 %v3356_v57, %s3201_s15 }
 0x952   :  { %1178 = vrot.lane.b32.xlu1 %v3342_v45, %s3202_s16 }
 0x956   :  { %1228 = vrot.lane.b32.xlu1 %v3346_v47, %s3202_s16 }
 0x95a   :  { %1226 = vrot.lane.b32.xlu1 %v3346_v47, %s3203_s17 }
 0x9c8   :  { %v1047_v43 = vpop.xlane.xlu0 %1046 }
 0x9c9   :  { %v1051_v44 = vsub.f32 %v990_v31, %v1047_v43 }
 0x9ca   :  { %v1050_v46 = vpop.xlane.xlu1 %1049 }
 0x9cb   :  { %v1053_v48 = vmul.f32 1.442695, %v1051_v44  ;;  %v1052_v49 = vsub.f32 %v1040_v36, %v1050_v46 }
 0x9cd   :  { %3078 = vpow2.f32 %v1053_v48  ;;  %v1055_v50 = vmul.f32 1.442695, %v1052_v49 }
 0x9ce   :  { %v1118_v51 = vpop.permute.xlu1 %1117 }
 0x9cf   :  { %3080 = vpow2.f32 %v1055_v50  ;;  %v1123_v52 = vsel %vm389_vm3, %v1118_v51, 0 }
 0x9d0   :  { %2853 = vmatpush3.bf16.msra.mxu1 %v1123_v52 }
 0x9d1   :  { %2864 = vmatprep.subr.bf16.mxu1 %v3192_v12 }
 0x9d2   :  { %v1179_v1 = vpop.permute.xlu1 %1178 }
 0x9d3   :  { %v1184_v7 = vsel %vm266_vm2, %v1179_v1, 0 }
 0x9d6   :  { %v1229_v6 = vpop.permute.xlu1 %1228 }
 0x9d7   :  { %v3079_v53 = vpop.eup %3078  ;;  %v1234_v9 = vsel %vm266_vm2, %v1229_v6, 0 }
 0x9d8   :  { %v1057_v54 = vsel %vm266_vm2, %v3079_v53, 0.0 }
 0x9d9   :  { %v3081_v56 = vpop.eup %3080  ;;  %1058 = vadd.xlane.f32.xlu0 %v1057_v54 }
 0x9da   :  { %v1060_v58 = vsel %vm266_vm2, %v3081_v56, 0.0  ;;  %v1227_v13 = vpop.permute.xlu1 %1226 }
 0x9dd   :  { %1061 = vadd.xlane.f32.xlu0 %v1060_v58 }
 0x9f3   :  { %1069 = vrot.lane.b32.xlu0 %v3352_v55, %s3201_s15 }
 0x9f7   :  { %1176 = vrot.lane.b32.xlu0 %v3342_v45, %s3203_s17 }
 0xa66   :  { %v1059_v59 = vpop.xlane.xlu0 %1058 }
 0xa67   :  { %3082 = vrcp.f32 %v1059_v59 }
 0xa6a   :  { %v1062_v60 = vpop.xlane.xlu0 %1061 }
 0xa6b   :  { %3084 = vrcp.f32 %v1062_v60 }
 0xa6e   :  { %v1070_v61 = vpop.permute.xlu0 %1069 }
 0xa6f   :  { %v1075_v62 = vsel %vm389_vm3, %v1070_v61, 0 }
 0xa70   :  { %2847 = vmatpush3.bf16.msra.mxu0 %v1075_v62 }
 0xa71   :  { %v3083_v63 = vpop.eup %3082  ;;  %2858 = vmatprep.subr.bf16.mxu0 %v3192_v12 }
 0xa72   :  { %v1065_v2 = vmul.f32 %v3083_v63, %v3079_v53  ;;  %v1177_v10 = vpop.permute.xlu0 %1176 }
 0xa74   :  { %v1067_v3 = vpack.c.bf16 %v1065_v2, %v1065_v2 }
 0xa75   :  { %v3085_v4 = vpop.eup %3084 }
 0xa76   :  { %v1066_v5 = vmul.f32 %v3085_v4, %v3081_v56  ;;  %2849 = vmatmul.mubr.msk.bf16.vlgmr.msra.gmra.mrb[36].mxu0 %vm266_vm2, %v1067_v3 }
 0xa77   :  { %2860 = vmatprep.mubr.msk.bf16.mxu0 %vm3193_vm1, %v3192_v12 }
 0xa78   :  { %v1068_v8 = vpack.c.bf16 %v1066_v5, %v1066_v5 }
 0xa79   :  { %2859 = vmatpush3.bf16.xpose.msra.mxu0 %v1184_v7 }
 0xa7a   :  { %2855 = vmatmul.mubr.msk.bf16.vlgmr.msra.gmra.mrb[28].mxu1 %vm266_vm2, %v1068_v8  ;;  %2870 = vmatprep.subr.bf16.mxu0 %v3192_v12 }
 0xa7b   :  { %2865 = vmatpush3.bf16.xpose.msra.mxu1 %v1234_v9  ;;  %2866 = vmatprep.mubr.msk.bf16.mxu1 %vm3193_vm1, %v3192_v12 }
 0xa7c   :  { %2876 = vmatprep.subr.bf16.mxu1 %v3192_v12 }
 0xa80   :  { %2861 = vmatmul.mubr.msk.bf16.vlgmr.msra.gmra.mrb[40].mxu0 %vm266_vm2, %v1177_v10 }
 0xa81   :  { %2872 = vmatprep.mubr.msk.bf16.mxu0 %vm3193_vm1, %v3192_v12 }
 0xa82   :  { %2867 = vmatmul.mubr.msk.bf16.vlgmr.msra.gmra.mrb[32].mxu1 %vm266_vm2, %v1227_v13 }
 0xa83   :  { %2878 = vmatprep.mubr.msk.bf16.mxu1 %vm3193_vm1, %v3192_v12 }
 0xb49   :  { %v3528_v14 = vpop.f32.mrb[36].mxu0 }
 0xb4a   :  { %v2850_v15 = vpop.f32.mrb[37].mxu0 }
 0xb4b   :  { %v1114_v16 = vpop.f32.mrb[38].mxu0 }
 0xb4c   :  { %v2851_v17 = vpop.f32.mrb[39].mxu0 }
 0xb4d   :  { %v3530_v18 = vpop.f32.mrb[28].mxu1 }
 0xb4e   :  { %v2856_v19 = vpop.f32.mrb[29].mxu1 }
 0xb4f   :  { %v1162_v20 = vpop.f32.mrb[30].mxu1 }
 0xb50   :  { %v2857_v22 = vpop.f32.mrb[31].mxu1 }
 0xb53   :  { %v1220_v23 = vpop.f32.mrb[40].mxu0 }
 0xb54   :  { %v1221_v24 = vadd.f32 %v1220_v23, %v3372_v0  ;;  %v2862_v26 = vpop.f32.mrb[41].mxu0 }
 0xb55   :  { %v1223_v27 = vpop.f32.mrb[42].mxu0  ;;  %v1270_v28 = vpop.f32.mrb[32].mxu1 }
 0xb56   :  { %v1271_v29 = vadd.f32 %v1270_v28, %v3372_v0  ;;  %v2863_v31 = vpop.f32.mrb[43].mxu0  ;;  %v2868_v32 = vpop.f32.mrb[33].mxu1  ;;  %v1276_v33 = vsel %vm266_vm2, %v1221_v24, -inf }
 0xb57   :  { %v1273_v35 = vpop.f32.mrb[34].mxu1  ;;  %1277 = vmax.xlane.f32.xlu0 %v1276_v33 }
 0xb58   :  { %v2869_v36 = vpop.f32.mrb[35].mxu1  ;;  %v1279_v37 = vsel %vm266_vm2, %v1271_v29, -inf }
 0xb59   :  { %1280 = vmax.xlane.f32.xlu1 %v1279_v37 }
 0xb6a   :  { %1348 = vrot.lane.b32.xlu1 %v3356_v57, %s3203_s17 }
 0xb6e   :  { %1409 = vrot.lane.b32.xlu1 %v3342_v45, %s3204_s18 }
 0xb72   :  { %1459 = vrot.lane.b32.xlu1 %v3346_v47, %s3204_s18 }
 0xb76   :  { %1457 = vrot.lane.b32.xlu1 %v3346_v47, %s3205_s19 }
 0xbe4   :  { %v1278_v38 = vpop.xlane.xlu0 %1277 }
 0xbe5   :  { %v1282_v39 = vsub.f32 %v1221_v24, %v1278_v38 }
 0xbe6   :  { %v1281_v40 = vpop.xlane.xlu1 %1280 }
 0xbe7   :  { %v1284_v41 = vmul.f32 1.442695, %v1282_v39  ;;  %v1283_v42 = vsub.f32 %v1271_v29, %v1281_v40 }
 0xbe9   :  { %3086 = vpow2.f32 %v1284_v41  ;;  %v1286_v43 = vmul.f32 1.442695, %v1283_v42 }
 0xbea   :  { %v1349_v44 = vpop.permute.xlu1 %1348 }
 0xbeb   :  { %3088 = vpow2.f32 %v1286_v43  ;;  %v1354_v46 = vsel %vm389_vm3, %v1349_v44, 0 }
 0xbec   :  { %2877 = vmatpush3.bf16.msra.mxu1 %v1354_v46 }
 0xbed   :  { %2888 = vmatprep.subr.bf16.mxu1 %v3192_v12 }
 0xbee   :  { %v1410_v59 = vpop.permute.xlu1 %1409 }
 0xbef   :  { %v1415_v2 = vsel %vm266_vm2, %v1410_v59, 0 }
 0xbf2   :  { %v1460_v1 = vpop.permute.xlu1 %1459 }
 0xbf3   :  { %v3087_v48 = vpop.eup %3086  ;;  %v1465_v4 = vsel %vm266_vm2, %v1460_v1, 0 }
 0xbf4   :  { %v1288_v49 = vsel %vm266_vm2, %v3087_v48, 0.0 }
 0xbf5   :  { %v3089_v50 = vpop.eup %3088  ;;  %1289 = vadd.xlane.f32.xlu0 %v1288_v49 }
 0xbf6   :  { %v1291_v51 = vsel %vm266_vm2, %v3089_v50, 0.0  ;;  %v1458_v6 = vpop.permute.xlu1 %1457 }
 0xbf9   :  { %1292 = vadd.xlane.f32.xlu0 %v1291_v51 }
 0xc0f   :  { %1300 = vrot.lane.b32.xlu0 %v3352_v55, %s3203_s17 }
 0xc13   :  { %1407 = vrot.lane.b32.xlu0 %v3342_v45, %s3205_s19 }
 0xc82   :  { %v1290_v52 = vpop.xlane.xlu0 %1289 }
 0xc83   :  { %3090 = vrcp.f32 %v1290_v52 }
 0xc86   :  { %v1293_v53 = vpop.xlane.xlu0 %1292 }
 0xc87   :  { %3092 = vrcp.f32 %v1293_v53 }
 0xc8a   :  { %v1301_v54 = vpop.permute.xlu0 %1300 }
 0xc8b   :  { %v1306_v56 = vsel %vm389_vm3, %v1301_v54, 0 }
 0xc8c   :  { %2871 = vmatpush3.bf16.msra.mxu0 %v1306_v56 }
 0xc8d   :  { %v3091_v58 = vpop.eup %3090  ;;  %2882 = vmatprep.subr.bf16.mxu0 %v3192_v12 }
 0xc8e   :  { %v1296_v60 = vmul.f32 %v3091_v58, %v3087_v48  ;;  %v1408_v5 = vpop.permute.xlu0 %1407 }
 0xc90   :  { %v1298_v61 = vpack.c.bf16 %v1296_v60, %v1296_v60 }
 0xc91   :  { %v3093_v62 = vpop.eup %3092 }
 0xc92   :  { %v1297_v63 = vmul.f32 %v3093_v62, %v3089_v50  ;;  %2873 = vmatmul.mubr.msk.bf16.vlgmr.msra.gmra.mrb[44].mxu0 %vm266_vm2, %v1298_v61 }
 0xc93   :  { %2884 = vmatprep.mubr.msk.bf16.mxu0 %vm3193_vm1, %v3192_v12 }
 0xc94   :  { %v1299_v3 = vpack.c.bf16 %v1297_v63, %v1297_v63 }
 0xc95   :  { %2883 = vmatpush3.bf16.xpose.msra.mxu0 %v1415_v2 }
 0xc96   :  { %2879 = vmatmul.mubr.msk.bf16.vlgmr.msra.gmra.mrb[36].mxu1 %vm266_vm2, %v1299_v3  ;;  %2894 = vmatprep.subr.bf16.mxu0 %v3192_v12 }
 0xc97   :  { %2889 = vmatpush3.bf16.xpose.msra.mxu1 %v1465_v4  ;;  %2890 = vmatprep.mubr.msk.bf16.mxu1 %vm3193_vm1, %v3192_v12 }
 0xc98   :  { %2900 = vmatprep.subr.bf16.mxu1 %v3192_v12 }
 0xc9c   :  { %2885 = vmatmul.mubr.msk.bf16.vlgmr.msra.gmra.mrb[48].mxu0 %vm266_vm2, %v1408_v5 }
 0xc9d   :  { %2896 = vmatprep.mubr.msk.bf16.mxu0 %vm3193_vm1, %v3192_v12 }
 0xc9e   :  { %2891 = vmatmul.mubr.msk.bf16.vlgmr.msra.gmra.mrb[40].mxu1 %vm266_vm2, %v1458_v6 }
 0xc9f   :  { %2902 = vmatprep.mubr.msk.bf16.mxu1 %vm3193_vm1, %v3192_v12 }
 0xd65   :  { %v3570_v7 = vpop.f32.mrb[44].mxu0 }
 0xd66   :  { %v2874_v8 = vpop.f32.mrb[45].mxu0 }
 0xd67   :  { %v1345_v9 = vpop.f32.mrb[46].mxu0 }
 0xd68   :  { %v2875_v10 = vpop.f32.mrb[47].mxu0 }
 0xd69   :  { %v3572_v13 = vpop.f32.mrb[36].mxu1 }
 0xd6a   :  { %v2880_v15 = vpop.f32.mrb[37].mxu1 }
 0xd6b   :  { %v1393_v16 = vpop.f32.mrb[38].mxu1 }
 0xd6c   :  { %v2881_v17 = vpop.f32.mrb[39].mxu1 }
 0xd6f   :  { %v1451_v19 = vpop.f32.mrb[48].mxu0 }
 0xd70   :  { %v1452_v20 = vadd.f32 %v1451_v19, %v3372_v0  ;;  %v2886_v22 = vpop.f32.mrb[49].mxu0 }
 0xd71   :  { %v1454_v23 = vpop.f32.mrb[50].mxu0  ;;  %v1501_v24 = vpop.f32.mrb[40].mxu1 }
 0xd72   :  { %v1502_v26 = vadd.f32 %v1501_v24, %v3372_v0  ;;  %v2887_v27 = vpop.f32.mrb[51].mxu0  ;;  %v2892_v28 = vpop.f32.mrb[41].mxu1  ;;  %v1507_v29 = vsel %vm266_vm2, %v1452_v20, -inf }
 0xd73   :  { %v1504_v31 = vpop.f32.mrb[42].mxu1  ;;  %1508 = vmax.xlane.f32.xlu0 %v1507_v29 }
 0xd74   :  { %v2893_v32 = vpop.f32.mrb[43].mxu1  ;;  %v1510_v33 = vsel %vm266_vm2, %v1502_v26, -inf }
 0xd75   :  { %1511 = vmax.xlane.f32.xlu1 %v1510_v33 }
 0xd86   :  { %1579 = vrot.lane.b32.xlu1 %v3356_v57, %s3205_s19 }
 0xd8a   :  { %1640 = vrot.lane.b32.xlu1 %v3342_v45, %s3206_s20 }
 0xd8e   :  { %1690 = vrot.lane.b32.xlu1 %v3346_v47, %s3206_s20 }
 0xd92   :  { %1688 = vrot.lane.b32.xlu1 %v3346_v47, %s3207_s21 }
 0xe00   :  { %v1509_v35 = vpop.xlane.xlu0 %1508 }
 0xe01   :  { %v1513_v36 = vsub.f32 %v1452_v20, %v1509_v35 }
 0xe02   :  { %v1512_v37 = vpop.xlane.xlu1 %1511 }
 0xe03   :  { %v1515_v38 = vmul.f32 1.442695, %v1513_v36  ;;  %v1514_v39 = vsub.f32 %v1502_v26, %v1512_v37 }
 0xe05   :  { %3094 = vpow2.f32 %v1515_v38  ;;  %v1517_v40 = vmul.f32 1.442695, %v1514_v39 }
 0xe06   :  { %v1580_v41 = vpop.permute.xlu1 %1579 }
 0xe07   :  { %3096 = vpow2.f32 %v1517_v40  ;;  %v1585_v42 = vsel %vm389_vm3, %v1580_v41, 0 }
 0xe08   :  { %2901 = vmatpush3.bf16.msra.mxu1 %v1585_v42 }
 0xe09   :  { %2912 = vmatprep.subr.bf16.mxu1 %v3192_v12 }
 0xe0a   :  { %v1641_v54 = vpop.permute.xlu1 %1640 }
 0xe0b   :  { %v1646_v62 = vsel %vm266_vm2, %v1641_v54, 0 }
 0xe0e   :  { %v1691_v61 = vpop.permute.xlu1 %1690 }
 0xe0f   :  { %v3095_v43 = vpop.eup %3094  ;;  %v1696_v1 = vsel %vm266_vm2, %v1691_v61, 0 }
 0xe10   :  { %v1519_v44 = vsel %vm266_vm2, %v3095_v43, 0.0 }
 0xe11   :  { %v3097_v46 = vpop.eup %3096  ;;  %1520 = vadd.xlane.f32.xlu0 %v1519_v44 }
 0xe12   :  { %v1522_v48 = vsel %vm266_vm2, %v3097_v46, 0.0  ;;  %v1689_v3 = vpop.permute.xlu1 %1688 }
 0xe15   :  { %1523 = vadd.xlane.f32.xlu0 %v1522_v48 }
 0xe2b   :  { %1531 = vrot.lane.b32.xlu0 %v3352_v55, %s3205_s19 }
 0xe2f   :  { %1638 = vrot.lane.b32.xlu0 %v3342_v45, %s3207_s21 }
 0xe9e   :  { %v1521_v49 = vpop.xlane.xlu0 %1520 }
 0xe9f   :  { %3098 = vrcp.f32 %v1521_v49 }
 0xea2   :  { %v1524_v50 = vpop.xlane.xlu0 %1523 }
 0xea3   :  { %3100 = vrcp.f32 %v1524_v50 }
 0xea6   :  { %v1532_v51 = vpop.permute.xlu0 %1531 }
 0xea7   :  { %v1537_v52 = vsel %vm389_vm3, %v1532_v51, 0 }
 0xea8   :  { %2895 = vmatpush3.bf16.msra.mxu0 %v1537_v52 }
 0xea9   :  { %v3099_v53 = vpop.eup %3098  ;;  %2906 = vmatprep.subr.bf16.mxu0 %v3192_v12 }
 0xeaa   :  { %v1527_v56 = vmul.f32 %v3099_v53, %v3095_v43  ;;  %v1639_v2 = vpop.permute.xlu0 %1638 }
 0xeac   :  { %v1529_v58 = vpack.c.bf16 %v1527_v56, %v1527_v56 }
 0xead   :  { %v3101_v59 = vpop.eup %3100 }
 0xeae   :  { %v1528_v60 = vmul.f32 %v3101_v59, %v3097_v46  ;;  %2897 = vmatmul.mubr.msk.bf16.vlgmr.msra.gmra.mrb[52].mxu0 %vm266_vm2, %v1529_v58 }
 0xeaf   :  { %2908 = vmatprep.mubr.msk.bf16.mxu0 %vm3193_vm1, %v3192_v12 }
 0xeb0   :  { %v1530_v63 = vpack.c.bf16 %v1528_v60, %v1528_v60 }
 0xeb1   :  { %2907 = vmatpush3.bf16.xpose.msra.mxu0 %v1646_v62 }
 0xeb2   :  { %2903 = vmatmul.mubr.msk.bf16.vlgmr.msra.gmra.mrb[44].mxu1 %vm266_vm2, %v1530_v63  ;;  %2918 = vmatprep.subr.bf16.mxu0 %v3192_v12 }
 0xeb3   :  { %2913 = vmatpush3.bf16.xpose.msra.mxu1 %v1696_v1  ;;  %2914 = vmatprep.mubr.msk.bf16.mxu1 %vm3193_vm1, %v3192_v12 }
 0xeb4   :  { %2924 = vmatprep.subr.bf16.mxu1 %v3192_v12 }
 0xeb8   :  { %2909 = vmatmul.mubr.msk.bf16.vlgmr.msra.gmra.mrb[56].mxu0 %vm266_vm2, %v1639_v2 }
 0xeb9   :  { %2920 = vmatprep.mubr.msk.bf16.mxu0 %vm3193_vm1, %v3192_v12 }
 0xeba   :  { %2915 = vmatmul.mubr.msk.bf16.vlgmr.msra.gmra.mrb[48].mxu1 %vm266_vm2, %v1689_v3 }
 0xebb   :  { %2926 = vmatprep.mubr.msk.bf16.mxu1 %vm3193_vm1, %v3192_v12 }
 0xf81   :  { %v3612_v4 = vpop.f32.mrb[52].mxu0 }
 0xf82   :  { %v2898_v5 = vpop.f32.mrb[53].mxu0 }
 0xf83   :  { %v1576_v6 = vpop.f32.mrb[54].mxu0 }
 0xf84   :  { %v2899_v8 = vpop.f32.mrb[55].mxu0 }
 0xf85   :  { %v3614_v9 = vpop.f32.mrb[44].mxu1 }
 0xf86   :  { %v2904_v10 = vpop.f32.mrb[45].mxu1 }
 0xf87   :  { %v1624_v15 = vpop.f32.mrb[46].mxu1 }
 0xf88   :  { %v2905_v16 = vpop.f32.mrb[47].mxu1 }
 0xf8b   :  { %v1682_v17 = vpop.f32.mrb[56].mxu0 }
 0xf8c   :  { %v1683_v19 = vadd.f32 %v1682_v17, %v3372_v0  ;;  %v2910_v20 = vpop.f32.mrb[57].mxu0 }
 0xf8d   :  { %v1685_v22 = vpop.f32.mrb[58].mxu0  ;;  %v1732_v23 = vpop.f32.mrb[48].mxu1 }
 0xf8e   :  { %v1733_v24 = vadd.f32 %v1732_v23, %v3372_v0  ;;  %v2911_v26 = vpop.f32.mrb[59].mxu0  ;;  %v2916_v27 = vpop.f32.mrb[49].mxu1  ;;  %v1738_v28 = vsel %vm266_vm2, %v1683_v19, -inf }
 0xf8f   :  { %v1735_v29 = vpop.f32.mrb[50].mxu1  ;;  %1739 = vmax.xlane.f32.xlu0 %v1738_v28 }
 0xf90   :  { %v2917_v31 = vpop.f32.mrb[51].mxu1  ;;  %v1741_v32 = vsel %vm266_vm2, %v1733_v24, -inf }
 0xf91   :  { %1742 = vmax.xlane.f32.xlu1 %v1741_v32 }
 0xfa2   :  { %1810 = vrot.lane.b32.xlu1 %v3356_v57, %s3207_s21 }
 0xfa6   :  { %1871 = vrot.lane.b32.xlu1 %v3342_v45, %s3208_s22 }
 0xfaa   :  { %1921 = vrot.lane.b32.xlu1 %v3346_v47, %s3208_s22 }
 0xfae   :  { %1919 = vrot.lane.b32.xlu1 %v3346_v47, %s3209_s23 }
0x101c   :  { %v1740_v33 = vpop.xlane.xlu0 %1739 }
0x101d   :  { %v1744_v35 = vsub.f32 %v1683_v19, %v1740_v33 }
0x101e   :  { %v1743_v36 = vpop.xlane.xlu1 %1742 }
0x101f   :  { %v1746_v37 = vmul.f32 1.442695, %v1744_v35  ;;  %v1745_v38 = vsub.f32 %v1733_v24, %v1743_v36 }
0x1021   :  { %3102 = vpow2.f32 %v1746_v37  ;;  %v1748_v39 = vmul.f32 1.442695, %v1745_v38 }
0x1022   :  { %v1811_v40 = vpop.permute.xlu1 %1810 }
0x1023   :  { %3104 = vpow2.f32 %v1748_v39  ;;  %v1816_v41 = vsel %vm389_vm3, %v1811_v40, 0 }
0x1024   :  { %2925 = vmatpush3.bf16.msra.mxu1 %v1816_v41 }
0x1025   :  { %2936 = vmatprep.subr.bf16.mxu1 %v3192_v12 }
0x1026   :  { %v1872_v52 = vpop.permute.xlu1 %1871 }
0x102a   :  { %v1922_v59 = vpop.permute.xlu1 %1921 }
0x102b   :  { %v3103_v42 = vpop.eup %3102  ;;  %v1927_v61 = vsel %vm266_vm2, %v1922_v59, 0  ;;  %v3020_v59 = vld [vmem:[%s3832_s6 + $0x10] sm:$0xff]  }
0x102c   :  { %v1750_v43 = vsel %vm266_vm2, %v3103_v42, 0.0 }
0x102d   :  { %v3105_v44 = vpop.eup %3104  ;;  %1751 = vadd.xlane.f32.xlu0 %v1750_v43 }
0x102e   :  { %v1753_v47 = vsel %vm266_vm2, %v3105_v44, 0.0  ;;  %v1920_v63 = vpop.permute.xlu1 %1919 }
0x1031   :  { %1754 = vadd.xlane.f32.xlu0 %v1753_v47 }
0x1047   :  { %1762 = vrot.lane.b32.xlu0 %v3352_v55, %s3207_s21 }
0x104b   :  { %1869 = vrot.lane.b32.xlu0 %v3342_v45, %s3209_s23  ;;  %v1877_v45 = vsel %vm266_vm2, %v1872_v52, 0 }
0x10ba   :  { %v1752_v46 = vpop.xlane.xlu0 %1751 }
0x10bb   :  { %3106 = vrcp.f32 %v1752_v46 }
0x10be   :  { %v1755_v48 = vpop.xlane.xlu0 %1754 }
0x10bf   :  { %3108 = vrcp.f32 %v1755_v48 }
0x10c2   :  { %v1763_v49 = vpop.permute.xlu0 %1762 }
0x10c3   :  { %v1768_v50 = vsel %vm389_vm3, %v1763_v49, 0 }
0x10c4   :  { %2919 = vmatpush3.bf16.msra.mxu0 %v1768_v50 }
0x10c5   :  { %v3107_v51 = vpop.eup %3106  ;;  %2930 = vmatprep.subr.bf16.mxu0 %v3192_v12 }
0x10c6   :  { %v1758_v53 = vmul.f32 %v3107_v51, %v3103_v42  ;;  %v1870_v62 = vpop.permute.xlu0 %1869 }
0x10c8   :  { %v1760_v54 = vpack.c.bf16 %v1758_v53, %v1758_v53 }
0x10c9   :  { %v3109_v56 = vpop.eup %3108 }
0x10ca   :  { %v1759_v58 = vmul.f32 %v3109_v56, %v3105_v44  ;;  %2921 = vmatmul.mubr.msk.bf16.vlgmr.msra.gmra.mrb[60].mxu0 %vm266_vm2, %v1760_v54  ;;  %v3018_v56 = vld [vmem:[%s3832_s6] sm:$0xff]  }
0x10cb   :  { %2932 = vmatprep.mubr.msk.bf16.mxu0 %vm3193_vm1, %v3192_v12 }
0x10cc   :  { %v1761_v60 = vpack.c.bf16 %v1759_v58, %v1759_v58  ;;  %v3019_v58 = vld [vmem:[%s3832_s6 + $0x8] sm:$0xff]  }
0x10cd   :  { %2931 = vmatpush3.bf16.xpose.msra.mxu0 %v1877_v45  ;;  %v3021_v45 = vld [vmem:[%s3832_s6 + $0x18] sm:$0xff]  }
0x10ce   :  { %2927 = vmatmul.mubr.msk.bf16.vlgmr.msra.gmra.mrb[52].mxu1 %vm266_vm2, %v1761_v60  ;;  %2942 = vmatprep.subr.bf16.mxu0 %v3192_v12 }
0x10cf   :  { %2937 = vmatpush3.bf16.xpose.msra.mxu1 %v1927_v61  ;;  %2938 = vmatprep.mubr.msk.bf16.mxu1 %vm3193_vm1, %v3192_v12 }
0x10d0   :  { %2948 = vmatprep.subr.bf16.mxu1 %v3192_v12 }
0x10d4   :  { %2933 = vmatmul.mubr.msk.bf16.vlgmr.msra.gmra.mrb[64].mxu0 %vm266_vm2, %v1870_v62 }
0x10d5   :  { %2944 = vmatprep.mubr.msk.bf16.mxu0 %vm3193_vm1, %v3192_v12 }
0x10d6   :  { %2939 = vmatmul.mubr.msk.bf16.vlgmr.msra.gmra.mrb[56].mxu1 %vm266_vm2, %v1920_v63 }
0x10d7   :  { %2950 = vmatprep.mubr.msk.bf16.mxu1 %vm3193_vm1, %v3192_v12 }
0x119d   :  { %v3654_v1 = vpop.f32.mrb[60].mxu0 }
0x119e   :  { %v2922_v2 = vpop.f32.mrb[61].mxu0 }
0x119f   :  { %v1807_v3 = vpop.f32.mrb[62].mxu0 }
0x11a0   :  { %v2923_v5 = vpop.f32.mrb[63].mxu0 }
0x11a1   :  { %v1852_v6 = vpop.f32.mrb[52].mxu1 }
0x11a2   :  { %v2928_v8 = vpop.f32.mrb[53].mxu1 }
0x11a3   :  { %v1855_v10 = vpop.f32.mrb[54].mxu1 }
0x11a4   :  { %v2929_v15 = vpop.f32.mrb[55].mxu1 }
0x11a7   :  { %v1913_v16 = vpop.f32.mrb[64].mxu0 }
0x11a8   :  { %v1914_v17 = vadd.f32 %v1913_v16, %v3372_v0  ;;  %v2934_v19 = vpop.f32.mrb[65].mxu0 }
0x11a9   :  { %v1916_v20 = vpop.f32.mrb[66].mxu0  ;;  %v1963_v22 = vpop.f32.mrb[56].mxu1  ;;  %v3138_v19 = vld [vmem:[%s3826_s0] sm:$0xff] }
0x11aa   :  { %v1964_v23 = vadd.f32 %v1963_v22, %v3372_v0  ;;  %v2935_v24 = vpop.f32.mrb[67].mxu0  ;;  %v2940_v26 = vpop.f32.mrb[57].mxu1  ;;  %v1969_v27 = vsel %vm266_vm2, %v1914_v17, -inf }
0x11ab   :  { %v1966_v28 = vpop.f32.mrb[58].mxu1  ;;  %1970 = vmax.xlane.f32.xlu0 %v1969_v27  ;;  %v3139_v24 = vld [vmem:[%s3826_s0 + $0x8] sm:$0xff] }
0x11ac   :  { %v2941_v29 = vpop.f32.mrb[59].mxu1  ;;  %v1972_v31 = vsel %vm266_vm2, %v1964_v23, -inf }
0x11ad   :  { %1973 = vmax.xlane.f32.xlu1 %v1972_v31 }
0x11be   :  { %2041 = vrot.lane.b32.xlu1 %v3356_v57, %s3209_s23 }
0x11c2   :  { %705 = vrot.lane.b32.xlu1 %v3444_v30, %s3208_s22 }
0x11c6   :  { %707 = vrot.lane.b32.xlu1 %v3446_v34, %s3208_s22 }
0x11ca   :  { %938 = vrot.lane.b32.xlu1 %v3488_v25, %s3206_s20 }
0x11ce   :  { %1169 = vrot.lane.b32.xlu1 %v3530_v18, %s3204_s18 }
0x11d2   :  { %1400 = vrot.lane.b32.xlu1 %v3572_v13, %s3202_s16 }
0x11d6   :  { %1631 = vrot.lane.b32.xlu1 %v3614_v9, %s3200_s14 }
0x11da   :  { %1862 = vrot.lane.b32.xlu1 %v1852_v6, %s3198_s12 }
0x1238   :  { %v1971_v57 = vpop.xlane.xlu0 %1970 }
0x1239   :  { %v1975_v0 = vsub.f32 %v1914_v17, %v1971_v57 }
0x123a   :  { %v1974_v30 = vpop.xlane.xlu1 %1973 }
0x123b   :  { %v1977_v32 = vmul.f32 1.442695, %v1975_v0  ;;  %v1976_v33 = vsub.f32 %v1964_v23, %v1974_v30  ;;  %v3024_v0 = vld [vmem:[#allocation3 + $0x4] ss:$12 sps:$4 sm:$0xff]   ;;  %v3022_v30 = vld [vmem:[#allocation3] ss:$12 sps:$4 sm:$0xff]  }
0x123d   :  { %3110 = vpow2.f32 %v1977_v32  ;;  %v1979_v34 = vmul.f32 1.442695, %v1976_v33  ;;  %v3025_v32 = vld [vmem:[#allocation3 + $0x8] ss:$12 sps:$4 sm:$0xff]  }
0x123e   :  { %v2042_v35 = vpop.permute.xlu1 %2041  ;;  %v3028_v33 = vld [vmem:[#allocation3 + $0x1c] ss:$12 sps:$4 sm:$0xff]  }
0x123f   :  { %3112 = vpow2.f32 %v1979_v34  ;;  %v2047_v25 = vsel %vm389_vm3, %v2042_v35, 0  ;;  %v3026_v34 = vld [vmem:[#allocation3 + $0x18] ss:$12 sps:$4 sm:$0xff]   ;;  %v3029_v35 = vld [vmem:[#allocation3 + $0x20] ss:$12 sps:$4 sm:$0xff]  }
0x1240   :  { %2949 = vmatpush3.bf16.msra.mxu1 %v2047_v25  ;;  %v3032_v25 = vld [vmem:[#allocation3 + $0x34] ss:$12 sps:$4 sm:$0xff]  }
0x1241   :  { %2290 = vmatprep.subr.bf16.mxu1 %v3024_v0 }
0x1242   :  { %v706_v18 = vpop.permute.xlu1 %705 }
0x1243   :  { %712 = vst.msk [vmem:[#allocation2] sm:$0xff] %vm711_vm5, %v706_v18  ;;  %v3030_v18 = vld [vmem:[#allocation3 + $0x30] ss:$12 sps:$4 sm:$0xff]  }
0x1246   :  { %v708_v13 = vpop.permute.xlu1 %707 }
0x1247   :  { %v3111_v36 = vpop.eup %3110  ;;  %713 = vst.msk [vmem:[#allocation2 + $0x8] sm:$0xff] %vm711_vm5, %v708_v13  ;;  %v3033_v13 = vld [vmem:[#allocation3 + $0x38] ss:$12 sps:$4 sm:$0xff]  }
0x1248   :  { %v1981_v9 = vsel %vm266_vm2, %v3111_v36, 0.0 }
0x1249   :  { %v3113_v37 = vpop.eup %3112  ;;  %1982 = vadd.xlane.f32.xlu0 %v1981_v9  ;;  %v3036_v9 = vld [vmem:[#allocation3 + $0x4c] ss:$12 sps:$4 sm:$0xff]  }
0x124a   :  { %v939_v38 = vpop.permute.xlu1 %938  ;;  %v1984_v39 = vsel %vm266_vm2, %v3113_v37, 0.0 }
0x124b   :  { %944 = vst.msk [vmem:[#allocation2 + $0x8] sm:$0xff] %vm942_vm6, %v939_v38 }
0x124d   :  { %1985 = vadd.xlane.f32.xlu0 %v1984_v39 }
0x124e   :  { %v1170_v40 = vpop.permute.xlu1 %1169 }
0x124f   :  { %1175 = vst.msk [vmem:[#allocation2 + $0x8] sm:$0xff] %vm1173_vm7, %v1170_v40 }
0x1252   :  { %v1401_v41 = vpop.permute.xlu1 %1400 }
0x1253   :  { %1406 = vst.msk [vmem:[#allocation2 + $0x8] sm:$0xff] %vm1404_vm8, %v1401_v41 }
0x1256   :  { %v1632_v42 = vpop.permute.xlu1 %1631 }
0x1257   :  { %1637 = vst.msk [vmem:[#allocation2 + $0x8] sm:$0xff] %vm1635_vm9, %v1632_v42 }
0x125a   :  { %v1863_v43 = vpop.permute.xlu1 %1862 }
0x125b   :  { %1868 = vst.msk [vmem:[#allocation2 + $0x8] sm:$0xff] %vm1866_vm10, %v1863_v43 }
0x1263   :  { %1993 = vrot.lane.b32.xlu0 %v3352_v55, %s3209_s23 }
0x1267   :  { %936 = vrot.lane.b32.xlu0 %v3486_v21, %s3206_s20 }
0x126b   :  { %1167 = vrot.lane.b32.xlu0 %v3528_v14, %s3204_s18 }
0x126f   :  { %1398 = vrot.lane.b32.xlu0 %v3570_v7, %s3202_s16 }
0x1273   :  { %1629 = vrot.lane.b32.xlu0 %v3612_v4, %s3200_s14 }
0x1277   :  { %1860 = vrot.lane.b32.xlu0 %v3654_v1, %s3198_s12 }
0x12d6   :  { %v1983_v44 = vpop.xlane.xlu0 %1982 }
0x12d7   :  { %3114 = vrcp.f32 %v1983_v44 }
0x12da   :  { %v1986_v47 = vpop.xlane.xlu0 %1985 }
0x12db   :  { %3116 = vrcp.f32 %v1986_v47 }
0x12de   :  { %v1994_v55 = vpop.permute.xlu0 %1993 }
0x12df   :  { %v1999_v46 = vsel %vm389_vm3, %v1994_v55, 0 }
0x12e0   :  { %2943 = vmatpush3.bf16.msra.mxu0 %v1999_v46 }
0x12e1   :  { %v3115_v21 = vpop.eup %3114  ;;  %2954 = vmatprep.subr.bf16.mxu0 %v3192_v12 }
0x12e2   :  { %v1989_v14 = vmul.f32 %v3115_v21, %v3111_v36  ;;  %v937_v48 = vpop.permute.xlu0 %936  ;;  %v3034_v36 = vld [vmem:[#allocation3 + $0x48] ss:$12 sps:$4 sm:$0xff]  }
0x12e3   :  { %943 = vst.msk [vmem:[#allocation2] sm:$0xff] %vm942_vm6, %v937_v48 }
0x12e4   :  { %v1991_v7 = vpack.c.bf16 %v1989_v14, %v1989_v14 }
0x12e5   :  { %v3117_v4 = vpop.eup %3116 }
0x12e6   :  { %v1990_v49 = vmul.f32 %v3117_v4, %v3113_v37  ;;  %2945 = vmatmul.mubr.msk.bf16.vlgmr.msra.gmra.mrb[68].mxu0 %vm266_vm2, %v1991_v7  ;;  %v1168_v50 = vpop.permute.xlu0 %1167  ;;  %v3037_v37 = vld [vmem:[#allocation3 + $0x50] ss:$12 sps:$4 sm:$0xff]  }
0x12e7   :  { %1174 = vst.msk [vmem:[#allocation2] sm:$0xff] %vm1173_vm7, %v1168_v50  ;;  %2962 = vmatprep.mubr.msk.bf16.mxu0 %vm3193_vm1, %v3192_v12  ;;  %2955 = vmatpush3.bf16.msra.mxu0 %v3018_v56  ;;  %v3038_v7 = vld [vmem:[%s3834_s8] sm:$0xff]   ;;  %v3039_v4 = vld [vmem:[%s3834_s8 + $0x8] sm:$0xff]   ;;  %v3041_v50 = vld [vmem:[%s3834_s8 + $0x18] sm:$0xff]  }
0x12e8   :  { %v1992_v51 = vpack.c.bf16 %v1990_v49, %v1990_v49  ;;  %2956 = vmatprep.subr.bf16.mxu0 %v3192_v12  ;;  %v3040_v49 = vld [vmem:[%s3834_s8 + $0x10] sm:$0xff]   ;;  %v3046_v56 = vld [vmem:[%s3834_s8 + $0x40] sm:$0xff]  }
0x12ea   :  { %2951 = vmatmul.mubr.msk.bf16.vlgmr.msra.gmra.mrb[60].mxu1 %vm266_vm2, %v1992_v51  ;;  %v1399_v52 = vpop.permute.xlu0 %1398  ;;  %v3042_v51 = vld [vmem:[%s3834_s8 + $0x20] sm:$0xff]  }
0x12eb   :  { %1405 = vst.msk [vmem:[#allocation2] sm:$0xff] %vm1404_vm8, %v1399_v52  ;;  %2322 = vmatprep.mubr.bf16.mxu1 %v3191_v11  ;;  %2957 = vmatpush3.bf16.msra.mxu0 %v3019_v58  ;;  %v3043_v52 = vld [vmem:[%s3834_s8 + $0x28] sm:$0xff]  }
0x12ec   :  { %2958 = vmatprep.subr.bf16.mxu0 %v3192_v12  ;;  %2291 = vmatpush1.bf16.msra.mxu1 %v3022_v30  ;;  %v3047_v58 = vld [vmem:[%s3834_s8 + $0x48] sm:$0xff]  }
0x12ed   :  { %2292 = vmatprep.subr.bf16.mxu1 %v3028_v33 }
0x12ee   :  { %v1630_v53 = vpop.permute.xlu0 %1629 }
0x12ef   :  { %1636 = vst.msk [vmem:[#allocation2] sm:$0xff] %vm1635_vm9, %v1630_v53  ;;  %2959 = vmatpush3.bf16.msra.mxu0 %v3020_v59  ;;  %v3044_v53 = vld [vmem:[%s3834_s8 + $0x30] sm:$0xff]  }
0x12f0   :  { %2960 = vmatprep.subr.bf16.mxu0 %v3192_v12  ;;  %2293 = vmatpush1.bf16.msra.mxu1 %v3026_v34  ;;  %v3048_v59 = vld [vmem:[%s3834_s8 + $0x50] sm:$0xff]  }
0x12f1   :  { %2294 = vmatprep.subr.bf16.mxu1 %v3032_v25 }
0x12f2   :  { %v1861_v54 = vpop.permute.xlu0 %1860 }
0x12f3   :  { %1867 = vst.msk [vmem:[#allocation2] sm:$0xff] %vm1866_vm10, %v1861_v54  ;;  %2961 = vmatpush3.bf16.msra.mxu0 %v3021_v45  ;;  %v3045_v54 = vld [vmem:[%s3834_s8 + $0x38] sm:$0xff]  }
0x12f4   :  { %2966 = vmatprep.subr.bf16.mxu0 %v3192_v12  ;;  %2295 = vmatpush1.bf16.msra.mxu1 %v3030_v18  ;;  %v3049_v45 = vld [vmem:[%s3834_s8 + $0x58] sm:$0xff]   ;;  %s3210_s8 = smov [#allocation6]  }
0x12f5   :  { %2296 = vmatprep.subr.bf16.mxu1 %v3036_v9 }
0x12f8   :  { %2297 = vmatpush1.bf16.msra.mxu1 %v3034_v36 }
0x12f9   :  { %2525 = vmatprep.subr.bf16.mxu1 %v3191_v11 }
0x13b9   :  { %v2035_v60 = vpop.f32.mrb[68].mxu0 }
0x13ba   :  { %2091 = vrot.lane.b32.xlu0 %v2035_v60, %s3197_s2  ;;  %v2946_v61 = vpop.f32.mrb[69].mxu0 }
0x13bb   :  { %v2038_v62 = vpop.f32.mrb[70].mxu0 }
0x13bc   :  { %v2947_v63 = vpop.f32.mrb[71].mxu0 }
0x13bd   :  { %v2083_v1 = vpop.f32.mrb[60].mxu1 }
0x13be   :  { %2093 = vrot.lane.b32.xlu1 %v2083_v1, %s3197_s2  ;;  %v2952_v2 = vpop.f32.mrb[61].mxu1 }
0x13bf   :  { %v2086_v3 = vpop.f32.mrb[62].mxu1 }
0x13c0   :  { %v2953_v5 = vpop.f32.mrb[63].mxu1 }
0x142c   :  { %v2092_v6 = vpop.permute.xlu0 %2091 }
0x142d   :  { %2098 = vst.msk [vmem:[#allocation2] sm:$0xff] %vm2097_vm11, %v2092_v6 }
0x1430   :  { %v2094_v8 = vpop.permute.xlu1 %2093 }
0x1431   :  { %2099 = vst.msk [vmem:[#allocation2 + $0x8] sm:$0xff] %vm2097_vm11, %v2094_v8 }
0x1434   :  { %v2100_v10 = vld [vmem:[#allocation2] sm:$0xff] }
0x1438   :  { %v2101_v15 = vld [vmem:[#allocation2 + $0x8] sm:$0xff] }
0x1439   :  { %v2102_v16 = vpack.c.bf16 %v2101_v15, %v2100_v10 }
0x143b   :  { %2963 = vmatmul.mubr.msk.bf16.vlgmr.msra.gmra.mrb[72].mxu0 %vm52_vm0, %v2102_v16 }
0x143c   :  { %2974 = vmatprep.mubr.msk.bf16.mxu0 %vm3193_vm1, %v3192_v12  ;;  %2967 = vmatpush3.bf16.msra.mxu0 %v3025_v32 }
0x143d   :  { %2968 = vmatprep.subr.bf16.mxu0 %v3192_v12 }
0x1440   :  { %2969 = vmatpush3.bf16.msra.mxu0 %v3029_v35 }
0x1441   :  { %2970 = vmatprep.subr.bf16.mxu0 %v3192_v12 }
0x1444   :  { %2971 = vmatpush3.bf16.msra.mxu0 %v3033_v13 }
0x1445   :  { %2972 = vmatprep.subr.bf16.mxu0 %v3192_v12  ;;  %v2639_v12 = vld [vmem:[%s3830_s4] ss:$0 sm:$0xff] }
0x1448   :  { %2973 = vmatpush3.bf16.msra.mxu0 %v3037_v37 }
0x150e   :  { %v2172_v17 = vpop.f32.mrb[72].mxu0 }
0x150f   :  { %v3731_v20 = vadd.f32 %v3138_v19, %v2172_v17  ;;  %v2964_v22 = vpop.f32.mrb[73].mxu0 }
0x1510   :  { %v2175_v23 = vpop.f32.mrb[74].mxu0 }
0x1511   :  { %v3736_v26 = vadd.f32 %v3139_v24, %v2175_v23  ;;  %v2965_v27 = vpop.f32.mrb[75].mxu0  ;;  %v2181_v28 = vmul.f32 %v3731_v20, %v3731_v20 }
0x1513   :  { %v2183_v29 = vsel %vm52_vm0, %v2181_v28, 0.0  ;;  %v2182_v31 = vmul.f32 %v3736_v26, %v3736_v26 }
0x1514   :  { %2184 = vadd.xlane.f32.xlu0 %v2183_v29 }
0x1515   :  { %v2186_v57 = vsel %vm52_vm0, %v2182_v31, 0.0 }
0x1516   :  { %2187 = vadd.xlane.f32.xlu1 %v2186_v57 }
0x15a1   :  { %v2185_v38 = vpop.xlane.xlu0 %2184 }
0x15a2   :  { %v2189_v39 = vmul.f32 0.015625, %v2185_v38 }
0x15a3   :  { %v2188_v40 = vpop.xlane.xlu1 %2187 }
0x15a4   :  { %v2191_v41 = vadd.f32 1e-05, %v2189_v39  ;;  %v2190_v42 = vmul.f32 0.015625, %v2188_v40 }
0x15a6   :  { %3118 = vrsqrt.f32 %v2191_v41  ;;  %v2192_v43 = vadd.f32 1e-05, %v2190_v42 }
0x15a8   :  { %3120 = vrsqrt.f32 %v2192_v43 }
0x15b0   :  { %v3119_v44 = vpop.eup %3118 }
0x15b1   :  { %v2195_v47 = vmul.f32 %v3119_v44, %v3731_v20 }
0x15b2   :  { %v3121_v55 = vpop.eup %3120 }
0x15b3   :  { %v2196_v46 = vmul.f32 %v3121_v55, %v3736_v26  ;;  %v2204_v21 = vmul.f32 %v2639_v12, %v2195_v47 }
0x15b5   :  { %v2205_v14 = vmul.f32 %v2639_v12, %v2196_v46 }
0x15b7   :  { %v2206_v48 = vpack.c.bf16 %v2205_v14, %v2204_v21 }
0x15b9   :  { %2652 = vmatmul.mubr.msk.bf16.vlgmr.msra.gmra.mrb[64].mxu1 %vm52_vm0, %v2206_v48  ;;  %2975 = vmatmul.mubr.msk.bf16.vlgmr.msra.gmra.mrb[76].mxu0 %vm52_vm0, %v2206_v48 }
0x15ba   :  { %2526 = vmatpush1.bf16.msra.mxu1 %v3038_v7 }
0x15bb   :  { %2527 = vmatprep.subr.bf16.mxu1 %v3191_v11 }
0x15be   :  { %2528 = vmatpush1.bf16.msra.mxu1 %v3039_v4 }
0x15bf   :  { %2529 = vmatprep.subr.bf16.mxu1 %v3191_v11 }
0x15c2   :  { %2530 = vmatpush1.bf16.msra.mxu1 %v3040_v49 }
0x15c3   :  { %2531 = vmatprep.subr.bf16.mxu1 %v3191_v11 }
0x15c6   :  { %2532 = vmatpush1.bf16.msra.mxu1 %v3041_v50 }
0x15c7   :  { %2533 = vmatprep.subr.bf16.mxu1 %v3191_v11 }
0x15ca   :  { %2534 = vmatpush1.bf16.msra.mxu1 %v3042_v51 }
0x15cb   :  { %2535 = vmatprep.subr.bf16.mxu1 %v3191_v11 }
0x15ce   :  { %2536 = vmatpush1.bf16.msra.mxu1 %v3043_v52 }
0x15cf   :  { %2537 = vmatprep.subr.bf16.mxu1 %v3191_v11 }
0x15d2   :  { %2538 = vmatpush1.bf16.msra.mxu1 %v3044_v53 }
0x15d3   :  { %2539 = vmatprep.subr.bf16.mxu1 %v3191_v11 }
0x15d6   :  { %2540 = vmatpush1.bf16.msra.mxu1 %v3045_v54 }
0x15d7   :  { %2541 = vmatprep.subr.bf16.mxu1 %v3191_v11 }
0x15da   :  { %2542 = vmatpush1.bf16.msra.mxu1 %v3046_v56 }
0x15db   :  { %2543 = vmatprep.subr.bf16.mxu1 %v3191_v11 }
0x15de   :  { %2544 = vmatpush1.bf16.msra.mxu1 %v3047_v58 }
0x15df   :  { %2545 = vmatprep.subr.bf16.mxu1 %v3191_v11 }
0x15e2   :  { %2546 = vmatpush1.bf16.msra.mxu1 %v3048_v59 }
0x15e3   :  { %2547 = vmatprep.subr.bf16.mxu1 %v3191_v11 }
0x15e6   :  { %2548 = vmatpush1.bf16.msra.mxu1 %v3049_v45 }
0x168c   :  { %v2324_v60 = vpop.f32.mrb[64].mxu1  ;;  %v2367_v61 = vpop.f32.mrb[76].mxu0 }
0x168d   :  { %v2326_v62 = vpop.f32.mrb[65].mxu1  ;;  %2408 = vrot.lane.b32.xlu1 %v2367_v61, %s3194_s5  ;;  %v2976_v63 = vpop.f32.mrb[77].mxu0  ;;  %v2654_v8 = vmul.f32 -1.442695, %v2324_v60 }
0x168e   :  { %2406 = vrot.lane.b32.xlu0 %v2326_v62, %s3194_s5  ;;  %v2328_v1 = vpop.f32.mrb[66].mxu1  ;;  %v2370_v2 = vpop.f32.mrb[78].mxu0  ;;  %v2655_v11 = vmul.f32 -1.442695, %v2326_v62 }
0x168f   :  { %v2330_v3 = vpop.f32.mrb[67].mxu1  ;;  %v2977_v5 = vpop.f32.mrb[79].mxu0  ;;  %v2656_v10 = vmul.f32 -1.442695, %v2328_v1 }
0x1690   :  { %v2657_v6 = vmul.f32 -1.442695, %v2330_v3  ;;  %3122 = vpow2.f32 %v2655_v11 }
0x1691   :  { %2412 = vrot.lane.b32.xlu1 %v2370_v2, %s3194_s5 }
0x1692   :  { %2410 = vrot.lane.b32.xlu0 %v2330_v3, %s3194_s5  ;;  %3124 = vpow2.f32 %v2657_v6  ;;  %s2575_s5 = sshll.u32 %s3210_s8, 4  ;;  %s2576_s5 = int_to_ptr.vmem [resolvable:$true] %s2575_s5 }
0x1693   :  { %3126 = vpow2.f32 %v2654_v8  ;;  %s3162_s11 = scalar_lea.vmem %s2576_s5, 256  ;;  %p3167_p9 = scmp.lt.s32.totalorder %s2576_s5, %s2576_s5 }
0x1694   :  { %3128 = vpow2.f32 %v2656_v10  ;;  %p3163_p8 = scmp.ne.s32.totalorder %s2576_s5, %s3162_s11  ;;  %p3168_p10 = scmp.lt.s32.totalorder %s3162_s11, %s3162_s11 }
0x1696   :  { %p3169_p11 = por %p3168_p10, %p3167_p9 }
0x1698   :  { %p3170_p12 = pnand %p3169_p11, %p3163_p8 }
0x169a   :  { %v3123_v15 = vpop.eup %3122 }
0x169b   :  { %v2387_v22 = vadd.f32 1.0, %v3123_v15 }
0x169c   :  { %v3125_v16 = vpop.eup %3124 }
0x169d   :  { %v3127_v17 = vpop.eup %3126  ;;  %v2389_v23 = vadd.f32 1.0, %v3125_v16  ;;  %3130 = vrcp.f32 %v2387_v22 }
0x169e   :  { %v3129_v19 = vpop.eup %3128  ;;  %v2386_v24 = vadd.f32 1.0, %v3127_v17 }
0x169f   :  { %v2388_v27 = vadd.f32 1.0, %v3129_v19  ;;  %3132 = vrcp.f32 %v2389_v23 }
0x16a0   :  { %3134 = vrcp.f32 %v2386_v24 }
0x16a1   :  { %3136 = vrcp.f32 %v2388_v27 }
0x16a7   :  { %v3131_v28 = vpop.eup %3130 }
0x16a8   :  { %v2399_v32 = vmul.f32 %v3131_v28, %v2326_v62 }
0x16a9   :  { %v3133_v29 = vpop.eup %3132 }
0x16aa   :  { %v3135_v57 = vpop.eup %3134  ;;  %v2401_v33 = vmul.f32 %v3133_v29, %v2330_v3 }
0x16ab   :  { %v3137_v30 = vpop.eup %3136  ;;  %v2398_v25 = vmul.f32 %v3135_v57, %v2324_v60 }
0x16ac   :  { %v2400_v18 = vmul.f32 %v3137_v30, %v2328_v1 }
0x16ff   :  { %v2409_v31 = vpop.permute.xlu1 %2408 }
0x1700   :  { %v2407_v0 = vpop.permute.xlu0 %2406  ;;  %v2421_v13 = vmul.f32 %v2409_v31, %v2399_v32 }
0x1701   :  { %v2414_v34 = vsel %vm52_vm0, %v2407_v0, %v2409_v31 }
0x1702   :  { %v2420_v38 = vmul.f32 %v2414_v34, %v2398_v25 }
0x1703   :  { %v2413_v35 = vpop.permute.xlu1 %2412 }
0x1704   :  { %v2423_v36 = vmul.f32 %v2413_v35, %v2401_v33  ;;  %v2411_v9 = vpop.permute.xlu0 %2410 }
0x1705   :  { %v2415_v37 = vsel %vm52_vm0, %v2411_v9, %v2413_v35 }
0x1706   :  { %v2425_v39 = vpack.c.bf16 %v2423_v36, %v2421_v13  ;;  %v2422_v40 = vmul.f32 %v2415_v37, %v2400_v18 }
0x1708   :  { %v2424_v41 = vpack.c.bf16 %v2422_v40, %v2420_v38  ;;  %2670 = vmatprep.mubr.msk.bf16.mxu1 %vm52_vm0, %v2425_v39 }
0x170a   :  { %2558 = vmatmul.mubr.bf16.vlgmr.msra.gmra.mrb[68].mxu1 %v2424_v41 }
0x17dd   :  { %v2559_v42 = vpop.f32.mrb[68].mxu1 }
0x17de   :  { %v2566_v43 = vadd.f32 %v2559_v42, %v3731_v20  ;;  %v2561_v44 = vpop.f32.mrb[69].mxu1 }
0x17df   :  { %v2562_v47 = vpop.f32.mrb[70].mxu1 }
0x17e0   :  { %2568 = vst.msk [vmem:[#allocation6] sm:$0xff] %vm52_vm0, %v2566_v43  ;;  %v2567_v55 = vadd.f32 %v2562_v47, %v3736_v26  ;;  %v2564_v12 = vpop.f32.mrb[71].mxu1 }
0x17e2   :  { %2569 = vst.msk [vmem:[#allocation6 + $0x8] sm:$0xff] %vm52_vm0, %v2567_v55 }
0x17e3   :  { %3173 = shalt.err (!%p3170_p12)
}
0x17e4   :  { %s3174_s2 = scalar_lea.hbm %s3835_s9, 256 }
0x17e5   :  { %p3175_p13 = scmp.ne.s32.totalorder %s3835_s9, %s3174_s2  ;;  %p3178_p0 = scmp.lt.u32.totalorder %s3174_s2, %s3835_s9 }
0x17e7   :  { %p3180_p1 = pnand %p3178_p0, %p3175_p13 }
0x17e9   :  { %3183 = shalt.err (!%p3180_p1)
}
0x17ea   :  { %s3211_s15 = smov 128  }
0x17eb   :  { %2581 = dma.vmem_to_hbm [thread:$0]  %s2576_s5, 256, %s3835_s9, [#allocation5], %s3211_s15, %s3211_s15, %s3208_s22  }
0x17ec   :  { %3186 = dma.done.wait [#allocation5], 256  }
0x17ed   :  { %3187 = vsyncadd [#allocation5], 4294967040 }
0x17ee   :  { %2585 = vsyncpa [#allocation4], 1 }
0x17ef   :  { %2586 = vsyncpa [#allocation5], 1 }

</bundles_post_ra>
